<compile_context>
chip_gen: v7x
topology: tpu7x:2x2x1
jax: 0.10.0
libtpu: 0.0.40
codegen_flags: <defaults>
</compile_context>

<pallas_src>
import functools
import math

import jax
import jax.numpy as jnp
from jax import lax
from jax.experimental import pallas as pl
from jax.experimental.pallas import tpu as pltpu

CFG = dict(
    vocab_size=128,
    context_length=16,
    emb_dim=32,
    n_heads=4,
    n_layers=2,
    drop_rate=0.0,
    qkv_bias=False,
)

EPS = 1e-5


# ---------------------------------------------------------------- helpers ----
def _layernorm(x, g, s):
    # Matches the book's LayerNorm: biased variance, eps=1e-5, scale & shift (f32).
    mean = jnp.mean(x, axis=-1, keepdims=True)
    var = jnp.mean((x - mean) ** 2, axis=-1, keepdims=True)
    return (x - mean) * lax.rsqrt(var + EPS) * g + s


def _gelu(x):
    # tanh-approximation GELU, as in the book's GELU module (f32, EUP tanh).
    return 0.5 * x * (1.0 + jnp.tanh(math.sqrt(2.0 / math.pi)
                                     * (x + 0.044715 * x * x * x)))


# ----------------------------------------------------------------- kernel ----
def _gpt_kernel(n_layers, n_heads,
                x_ref, wqkv_ref, wo_ref, bo_ref,
                w1_ref, b1_ref, w2_ref, b2_ref,
                g1_ref, s1_ref, g2_ref, s2_ref,
                gf_ref, sf_ref, wout_ref, o_ref):
    """Per-batch-row fused GPT fwd: L x (LN->MHA->res->LN->FF->res) + final LN + head."""
    x = x_ref[0]                                    # (T, D) f32 — batch dim is on grid
    T, D = x.shape
    Dh = D // n_heads
    bf16 = jnp.bfloat16

    # additive causal bias (0 / -1e30), hoisted out of the layer & head loops
    row = lax.broadcasted_iota(jnp.int32, (T, T), 0)
    col = lax.broadcasted_iota(jnp.int32, (T, T), 1)
    mask_bias = jnp.where(col <= row, 0.0, -1e30).astype(jnp.float32)   # (T, T)

    # TODO(synk): at real depth (L>=12) move the layer axis onto the grid ('arbitrary')
    # with (1, ...) weight blocks instead of this static unroll.
    for l in range(n_layers):
        # ---------------- multi-head causal self-attention ----------------
        xn = _layernorm(x, g1_ref[l], s1_ref[l])
        # fused QKV projection: one pure 2-D MXU matmul (M=T, N=3D).
        # 1/sqrt(Dh) is already folded into the Q columns of wqkv (see init_params).
        qkv = jnp.dot(xn.astype(bf16), wqkv_ref[l],
                      preferred_element_type=jnp.float32)        # (T, 3D) f32
        qkvb = qkv.astype(bf16)                                  # single cast per layer

        ctx_heads = []
        for h in range(n_heads):                    # static unroll over heads
            qh = qkvb[:, h * Dh:(h + 1) * Dh]
            kh = qkvb[:, D + h * Dh:D + (h + 1) * Dh]
            vh = qkvb[:, 2 * D + h * Dh:2 * D + (h + 1) * Dh]
            sc = jnp.einsum('td,sd->ts', qh, kh,
                            preferred_element_type=jnp.float32) + mask_bias
            sc = sc - jnp.max(sc, axis=-1, keepdims=True)
            p = jnp.exp(sc)                         # stable f32 softmax
            p = p * pl.reciprocal(jnp.sum(p, axis=-1, keepdims=True), approx=True)
            # TODO(synk): attention-weight dropout skipped (drop_rate=0.0 / eval mode).
            ctx_heads.append(jnp.dot(p.astype(bf16), vh,
                                     preferred_element_type=jnp.float32))
        ctx = jnp.concatenate(ctx_heads, axis=-1)                # (T, D)
        attn = jnp.dot(ctx.astype(bf16), wo_ref[l],
                       preferred_element_type=jnp.float32) + bo_ref[l]
        x = x + attn                                # residual (dropout = identity)

        # ------------------------------ feed forward ----------------------
        xn2 = _layernorm(x, g2_ref[l], s2_ref[l])
        h1 = jnp.dot(xn2.astype(bf16), w1_ref[l],
                     preferred_element_type=jnp.float32) + b1_ref[l]
        h1 = _gelu(h1)
        ff = jnp.dot(h1.astype(bf16), w2_ref[l],
                     preferred_element_type=jnp.float32) + b2_ref[l]
        x = x + ff                                  # residual (dropout = identity)

    # ------------------- final norm + vocab head (lane-dense V=128) --------
    xn = _layernorm(x, gf_ref[...], sf_ref[...])
    o_ref[0] = jnp.dot(xn.astype(bf16), wout_ref[...],
                       preferred_element_type=jnp.float32)


# --------------------------------------------------------------- wrapper -----
def _const_index_map(ndim):
    def imap(b):
        return (0,) * ndim
    return imap


def gpt_forward(params, in_idx, cfg):
    B, T = in_idx.shape
    D, V = cfg['emb_dim'], cfg['vocab_size']
    L, H = cfg['n_layers'], cfg['n_heads']

    # TODO(synk): token-embedding gather stays in JAX glue (data-dependent row gather).
    tok = params['tok_emb'][in_idx]                 # (B, T, D)
    pos = params['pos_emb'][:T]                     # (T, D)
    x = (tok + pos[None, :, :]).astype(jnp.float32)
    # drop_emb is identity (drop_rate = 0.0 / eval mode)

    weights = (params['wqkv'], params['wo'], params['bo'],
               params['w1'], params['b1'], params['w2'], params['b2'],
               params['g1'], params['s1'], params['g2'], params['s2'],
               params['final_g'], params['final_s'], params['out_w'])

    in_specs = ([pl.BlockSpec((1, T, D), lambda b: (b, 0, 0))]
                + [pl.BlockSpec(w.shape, _const_index_map(w.ndim)) for w in weights])
    out_specs = pl.BlockSpec((1, T, V), lambda b: (b, 0, 0))

    # advisory cost estimate for XLA scheduling of the surrounding gather/add glue
    flops = (L * 2 * B * T * D * (3 * D + D + 8 * D)     # QKV + out-proj + FF
             + L * 4 * B * H * T * T * (D // H)          # scores + context
             + 2 * B * T * D * V)                        # vocab head
    transcendentals = L * B * (H * T * T + T * 4 * D)    # exp + tanh
    bytes_accessed = (int(x.size) * 4
                      + sum(int(w.size) * w.dtype.itemsize for w in weights)
                      + B * T * V * 4)

    return pl.pallas_call(
        functools.partial(_gpt_kernel, L, H),
        out_shape=jax.ShapeDtypeStruct((B, T, V), jnp.float32),
        grid=(B,),
        in_specs=in_specs,
        out_specs=out_specs,
        compiler_params=pltpu.CompilerParams(
            dimension_semantics=("parallel",),           # batch rows -> v7x's 2 TCs
            vmem_limit_bytes=48 * 1024 * 1024),           # <= 64 MiB v7x physical
        cost_estimate=pl.CostEstimate(flops=flops,
                                      transcendentals=transcendentals,
                                      bytes_accessed=bytes_accessed),
    )(x, *weights)


# ------------------------------------------------------------------ params ---
def init_params(key, cfg):
    D, V, C = cfg['emb_dim'], cfg['vocab_size'], cfg['context_length']
    L, H = cfg['n_layers'], cfg['n_heads']
    Dh = D // H
    bf = jnp.bfloat16

    def nrm(k, shape):
        return 0.02 * jax.random.normal(k, shape, dtype=jnp.float32)

    ks = jax.random.split(key, 7)

    wqkv = nrm(ks[2], (L, D, 3 * D))                 # fused [W_q | W_k | W_v], (in,out)
    # 1/sqrt(Dh) attention scale folded into the Q columns (perf review):
    # (x Wq)(x Wk)^T / sqrt(Dh) == (x (Wq/sqrt(Dh)))(x Wk)^T  -- semantics preserved.
    wqkv = wqkv.at[:, :, :D].multiply(1.0 / math.sqrt(Dh))

    return dict(
        tok_emb=nrm(ks[0], (V, D)),
        pos_emb=nrm(ks[1], (C, D)),
        # per-layer weights stacked on a leading (n_layers, ...) axis.
        # matmul weights in bf16 (MXU-native); biases / LN params stay f32.
        wqkv=wqkv.astype(bf),
        wo=nrm(ks[3], (L, D, D)).astype(bf),
        bo=jnp.zeros((L, 1, D), jnp.float32),
        w1=nrm(ks[4], (L, D, 4 * D)).astype(bf),
        b1=jnp.zeros((L, 1, 4 * D), jnp.float32),
        w2=nrm(ks[5], (L, 4 * D, D)).astype(bf),
        b2=jnp.zeros((L, 1, D), jnp.float32),
        g1=jnp.ones((L, 1, D), jnp.float32),
        s1=jnp.zeros((L, 1, D), jnp.float32),
        g2=jnp.ones((L, 1, D), jnp.float32),
        s2=jnp.zeros((L, 1, D), jnp.float32),
        final_g=jnp.ones((1, D), jnp.float32),
        final_s=jnp.zeros((1, D), jnp.float32),
        out_w=nrm(ks[6], (D, V)).astype(bf),         # (emb_dim, vocab) == W_out.T
    )


# -------------------------------------------------------------------- main ---
if __name__ == "__main__":
    key = jax.random.PRNGKey(0)
    pkey, ikey = jax.random.split(key)
    params = init_params(pkey, CFG)

    B, T = 2, 8
    in_idx = jax.random.randint(ikey, (B, T), 0, CFG['vocab_size'],
                                dtype=jnp.int32)

    fwd = jax.jit(lambda p, idx: gpt_forward(p, idx, CFG))
    logits = fwd(params, in_idx)
    jax.block_until_ready(logits)

    assert logits.shape == (B, T, CFG['vocab_size'])
    assert logits.dtype == jnp.float32
    print("KERNEL_OK")
</pallas_src>

<mosaic_0001>
module attributes {stable_mosaic.version = 11 : i64} {
  func.func @_gpt_kernel(%arg0: i32, %arg1: memref<1x8x32xf32, #tpu.memory_space<vmem>>, %arg2: memref<2x32x96xbf16, #tpu.memory_space<vmem>>, %arg3: memref<2x32x32xbf16, #tpu.memory_space<vmem>>, %arg4: memref<2x1x32xf32, #tpu.memory_space<vmem>>, %arg5: memref<2x32x128xbf16, #tpu.memory_space<vmem>>, %arg6: memref<2x1x128xf32, #tpu.memory_space<vmem>>, %arg7: memref<2x128x32xbf16, #tpu.memory_space<vmem>>, %arg8: memref<2x1x32xf32, #tpu.memory_space<vmem>>, %arg9: memref<2x1x32xf32, #tpu.memory_space<vmem>>, %arg10: memref<2x1x32xf32, #tpu.memory_space<vmem>>, %arg11: memref<2x1x32xf32, #tpu.memory_space<vmem>>, %arg12: memref<2x1x32xf32, #tpu.memory_space<vmem>>, %arg13: memref<1x32xf32, #tpu.memory_space<vmem>>, %arg14: memref<1x32xf32, #tpu.memory_space<vmem>>, %arg15: memref<32x128xbf16, #tpu.memory_space<vmem>>, %arg16: memref<1x8x128xf32, #tpu.memory_space<vmem>>) attributes {dimension_semantics = [#tpu.dimension_semantics<parallel>], iteration_bounds = array<i64: 2>, scalar_prefetch = 0 : i64, scratch_operands = 0 : i64, tpu.core_type = #tpu.core_type<tc>, window_params = [{transform_indices = @transform_0, window_bounds = array<i64: 1, 8, 32>}, {pipeline_mode = #tpu.pipeline_mode<synchronous>, transform_indices = @transform_1, window_bounds = array<i64: 2, 32, 96>}, {pipeline_mode = #tpu.pipeline_mode<synchronous>, transform_indices = @transform_2, window_bounds = array<i64: 2, 32, 32>}, {pipeline_mode = #tpu.pipeline_mode<synchronous>, transform_indices = @transform_3, window_bounds = array<i64: 2, 1, 32>}, {pipeline_mode = #tpu.pipeline_mode<synchronous>, transform_indices = @transform_4, window_bounds = array<i64: 2, 32, 128>}, {pipeline_mode = #tpu.pipeline_mode<synchronous>, transform_indices = @transform_5, window_bounds = array<i64: 2, 1, 128>}, {pipeline_mode = #tpu.pipeline_mode<synchronous>, transform_indices = @transform_6, window_bounds = array<i64: 2, 128, 32>}, {pipeline_mode = #tpu.pipeline_mode<synchronous>, transform_indices = @transform_7, window_bounds = array<i64: 2, 1, 32>}, {pipeline_mode = #tpu.pipeline_mode<synchronous>, transform_indices = @transform_8, window_bounds = array<i64: 2, 1, 32>}, {pipeline_mode = #tpu.pipeline_mode<synchronous>, transform_indices = @transform_9, window_bounds = array<i64: 2, 1, 32>}, {pipeline_mode = #tpu.pipeline_mode<synchronous>, transform_indices = @transform_10, window_bounds = array<i64: 2, 1, 32>}, {pipeline_mode = #tpu.pipeline_mode<synchronous>, transform_indices = @transform_11, window_bounds = array<i64: 2, 1, 32>}, {pipeline_mode = #tpu.pipeline_mode<synchronous>, transform_indices = @transform_12, window_bounds = array<i64: 1, 32>}, {pipeline_mode = #tpu.pipeline_mode<synchronous>, transform_indices = @transform_13, window_bounds = array<i64: 1, 32>}, {pipeline_mode = #tpu.pipeline_mode<synchronous>, transform_indices = @transform_14, window_bounds = array<i64: 32, 128>}, {transform_indices = @transform_15, window_bounds = array<i64: 1, 8, 128>}]} {
    %c0 = arith.constant 0 : index
    %c0_0 = arith.constant 0 : index
    %c0_1 = arith.constant 0 : index
    %0 = vector.load %arg1[%c0, %c0_0, %c0_1] : memref<1x8x32xf32, #tpu.memory_space<vmem>>, vector<1x8x32xf32>
    %1 = vector.shape_cast %0 : vector<1x8x32xf32> to vector<8x32xf32>
    %2 = tpu.iota {dimensions = array<i32: 0>} : vector<8x8xi32>
    %3 = tpu.iota {dimensions = array<i32: 1>} : vector<8x8xi32>
    %4 = arith.cmpi sle, %3, %2 : vector<8x8xi32>
    %cst = arith.constant 0.000000e+00 : f32
    %cst_2 = arith.constant -1.000000e+30 : f32
    %5 = vector.broadcast %cst : f32 to vector<8x8xf32>
    %6 = vector.broadcast %cst_2 : f32 to vector<8x8xf32>
    %7 = arith.select %4, %5, %6 : vector<8x8xi1>, vector<8x8xf32>
    %c0_3 = arith.constant 0 : index
    %c0_4 = arith.constant 0 : index
    %c0_5 = arith.constant 0 : index
    %8 = vector.load %arg9[%c0_3, %c0_4, %c0_5] : memref<2x1x32xf32, #tpu.memory_space<vmem>>, vector<1x1x32xf32>
    %9 = vector.shape_cast %8 : vector<1x1x32xf32> to vector<1x32xf32>
    %c0_6 = arith.constant 0 : index
    %c0_7 = arith.constant 0 : index
    %c0_8 = arith.constant 0 : index
    %10 = vector.load %arg10[%c0_6, %c0_7, %c0_8] : memref<2x1x32xf32, #tpu.memory_space<vmem>>, vector<1x1x32xf32>
    %11 = vector.shape_cast %10 : vector<1x1x32xf32> to vector<1x32xf32>
    %cst_9 = arith.constant dense<0.000000e+00> : vector<8xf32>
    %12 = vector.multi_reduction <add>, %1, %cst_9 [1] : vector<8x32xf32> to vector<8xf32>
    %13 = vector.shape_cast %12 : vector<8xf32> to vector<8x1xf32>
    %cst_10 = arith.constant 3.200000e+01 : f32
    %14 = vector.broadcast %cst_10 : f32 to vector<8x1xf32>
    %15 = arith.divf %13, %14 : vector<8x1xf32>
    %16 = vector.broadcast %15 : vector<8x1xf32> to vector<8x32xf32>
    %17 = arith.subf %1, %16 : vector<8x32xf32>
    %18 = arith.mulf %17, %17 : vector<8x32xf32>
    %cst_11 = arith.constant dense<0.000000e+00> : vector<8xf32>
    %19 = vector.multi_reduction <add>, %18, %cst_11 [1] : vector<8x32xf32> to vector<8xf32>
    %20 = vector.shape_cast %19 : vector<8xf32> to vector<8x1xf32>
    %cst_12 = arith.constant 3.200000e+01 : f32
    %21 = vector.broadcast %cst_12 : f32 to vector<8x1xf32>
    %22 = arith.divf %20, %21 : vector<8x1xf32>
    %23 = vector.broadcast %15 : vector<8x1xf32> to vector<8x32xf32>
    %24 = arith.subf %1, %23 : vector<8x32xf32>
    %cst_13 = arith.constant 9.99999974E-6 : f32
    %25 = vector.broadcast %cst_13 : f32 to vector<8x1xf32>
    %26 = arith.addf %22, %25 : vector<8x1xf32>
    %27 = math.rsqrt %26 : vector<8x1xf32>
    %28 = vector.broadcast %27 : vector<8x1xf32> to vector<8x32xf32>
    %29 = arith.mulf %24, %28 : vector<8x32xf32>
    %30 = vector.broadcast %9 : vector<1x32xf32> to vector<8x32xf32>
    %31 = arith.mulf %29, %30 : vector<8x32xf32>
    %32 = vector.broadcast %11 : vector<1x32xf32> to vector<8x32xf32>
    %33 = arith.addf %31, %32 : vector<8x32xf32>
    %34 = arith.truncf %33 : vector<8x32xf32> to vector<8x32xbf16>
    %c0_14 = arith.constant 0 : index
    %c0_15 = arith.constant 0 : index
    %c0_16 = arith.constant 0 : index
    %35 = vector.load %arg2[%c0_14, %c0_15, %c0_16] : memref<2x32x96xbf16, #tpu.memory_space<vmem>>, vector<1x32x96xbf16>
    %36 = vector.shape_cast %35 : vector<1x32x96xbf16> to vector<32x96xbf16>
    %cst_17 = arith.constant dense<0.000000e+00> : vector<8x96xf32>
    %37 = tpu.matmul %34, %36, %cst_17 {dimension_numbers = #tpu.dot_dimension_numbers<[1], [0], [0], [1], [0, 0, 1, 1], [], []>} : vector<8x32xbf16>, vector<32x96xbf16>, vector<8x96xf32> -> vector<8x96xf32>
    %38 = arith.truncf %37 : vector<8x96xf32> to vector<8x96xbf16>
    %39 = vector.extract_strided_slice %38 {offsets = [0, 0], sizes = [8, 8], strides = [1, 1]} : vector<8x96xbf16> to vector<8x8xbf16>
    %40 = vector.extract_strided_slice %38 {offsets = [0, 32], sizes = [8, 8], strides = [1, 1]} : vector<8x96xbf16> to vector<8x8xbf16>
    %41 = vector.extract_strided_slice %38 {offsets = [0, 64], sizes = [8, 8], strides = [1, 1]} : vector<8x96xbf16> to vector<8x8xbf16>
    "tpu.trace_start"() <{level = 10 : i32, message = "td,sd->ts"}> : () -> ()
    %cst_18 = arith.constant dense<0.000000e+00> : vector<8x8xf32>
    %42 = tpu.matmul %39, %40, %cst_18 {dimension_numbers = #tpu.dot_dimension_numbers<[1], [1], [0], [0], [0, 0, 1, 0], [], []>} : vector<8x8xbf16>, vector<8x8xbf16>, vector<8x8xf32> -> vector<8x8xf32>
    "tpu.trace_stop"() : () -> ()
    %43 = arith.addf %42, %7 : vector<8x8xf32>
    %cst_19 = arith.constant dense<0xFF800000> : vector<8xf32>
    %44 = vector.multi_reduction <maximumf>, %43, %cst_19 [1] : vector<8x8xf32> to vector<8xf32>
    %45 = vector.shape_cast %44 : vector<8xf32> to vector<8x1xf32>
    %46 = vector.broadcast %45 : vector<8x1xf32> to vector<8x8xf32>
    %47 = arith.subf %43, %46 : vector<8x8xf32>
    %48 = math.exp %47 : vector<8x8xf32>
    %cst_20 = arith.constant dense<0.000000e+00> : vector<8xf32>
    %49 = vector.multi_reduction <add>, %48, %cst_20 [1] : vector<8x8xf32> to vector<8xf32>
    %50 = vector.shape_cast %49 : vector<8xf32> to vector<8x1xf32>
    %51 = tpu.reciprocal %50 {approx = true} : vector<8x1xf32> -> vector<8x1xf32>
    %52 = vector.broadcast %51 : vector<8x1xf32> to vector<8x8xf32>
    %53 = arith.mulf %48, %52 : vector<8x8xf32>
    %54 = arith.truncf %53 : vector<8x8xf32> to vector<8x8xbf16>
    %cst_21 = arith.constant dense<0.000000e+00> : vector<8x8xf32>
    %55 = tpu.matmul %54, %41, %cst_21 {dimension_numbers = #tpu.dot_dimension_numbers<[1], [0], [0], [1], [0, 0, 1, 1], [], []>} : vector<8x8xbf16>, vector<8x8xbf16>, vector<8x8xf32> -> vector<8x8xf32>
    %56 = vector.extract_strided_slice %38 {offsets = [0, 8], sizes = [8, 8], strides = [1, 1]} : vector<8x96xbf16> to vector<8x8xbf16>
    %57 = vector.extract_strided_slice %38 {offsets = [0, 40], sizes = [8, 8], strides = [1, 1]} : vector<8x96xbf16> to vector<8x8xbf16>
    %58 = vector.extract_strided_slice %38 {offsets = [0, 72], sizes = [8, 8], strides = [1, 1]} : vector<8x96xbf16> to vector<8x8xbf16>
    "tpu.trace_start"() <{level = 10 : i32, message = "td,sd->ts"}> : () -> ()
    %cst_22 = arith.constant dense<0.000000e+00> : vector<8x8xf32>
    %59 = tpu.matmul %56, %57, %cst_22 {dimension_numbers = #tpu.dot_dimension_numbers<[1], [1], [0], [0], [0, 0, 1, 0], [], []>} : vector<8x8xbf16>, vector<8x8xbf16>, vector<8x8xf32> -> vector<8x8xf32>
    "tpu.trace_stop"() : () -> ()
    %60 = arith.addf %59, %7 : vector<8x8xf32>
    %cst_23 = arith.constant dense<0xFF800000> : vector<8xf32>
    %61 = vector.multi_reduction <maximumf>, %60, %cst_23 [1] : vector<8x8xf32> to vector<8xf32>
    %62 = vector.shape_cast %61 : vector<8xf32> to vector<8x1xf32>
    %63 = vector.broadcast %62 : vector<8x1xf32> to vector<8x8xf32>
    %64 = arith.subf %60, %63 : vector<8x8xf32>
    %65 = math.exp %64 : vector<8x8xf32>
    %cst_24 = arith.constant dense<0.000000e+00> : vector<8xf32>
    %66 = vector.multi_reduction <add>, %65, %cst_24 [1] : vector<8x8xf32> to vector<8xf32>
    %67 = vector.shape_cast %66 : vector<8xf32> to vector<8x1xf32>
    %68 = tpu.reciprocal %67 {approx = true} : vector<8x1xf32> -> vector<8x1xf32>
    %69 = vector.broadcast %68 : vector<8x1xf32> to vector<8x8xf32>
    %70 = arith.mulf %65, %69 : vector<8x8xf32>
    %71 = arith.truncf %70 : vector<8x8xf32> to vector<8x8xbf16>
    %cst_25 = arith.constant dense<0.000000e+00> : vector<8x8xf32>
    %72 = tpu.matmul %71, %58, %cst_25 {dimension_numbers = #tpu.dot_dimension_numbers<[1], [0], [0], [1], [0, 0, 1, 1], [], []>} : vector<8x8xbf16>, vector<8x8xbf16>, vector<8x8xf32> -> vector<8x8xf32>
    %73 = vector.extract_strided_slice %38 {offsets = [0, 16], sizes = [8, 8], strides = [1, 1]} : vector<8x96xbf16> to vector<8x8xbf16>
    %74 = vector.extract_strided_slice %38 {offsets = [0, 48], sizes = [8, 8], strides = [1, 1]} : vector<8x96xbf16> to vector<8x8xbf16>
    %75 = vector.extract_strided_slice %38 {offsets = [0, 80], sizes = [8, 8], strides = [1, 1]} : vector<8x96xbf16> to vector<8x8xbf16>
    "tpu.trace_start"() <{level = 10 : i32, message = "td,sd->ts"}> : () -> ()
    %cst_26 = arith.constant dense<0.000000e+00> : vector<8x8xf32>
    %76 = tpu.matmul %73, %74, %cst_26 {dimension_numbers = #tpu.dot_dimension_numbers<[1], [1], [0], [0], [0, 0, 1, 0], [], []>} : vector<8x8xbf16>, vector<8x8xbf16>, vector<8x8xf32> -> vector<8x8xf32>
    "tpu.trace_stop"() : () -> ()
    %77 = arith.addf %76, %7 : vector<8x8xf32>
    %cst_27 = arith.constant dense<0xFF800000> : vector<8xf32>
    %78 = vector.multi_reduction <maximumf>, %77, %cst_27 [1] : vector<8x8xf32> to vector<8xf32>
    %79 = vector.shape_cast %78 : vector<8xf32> to vector<8x1xf32>
    %80 = vector.broadcast %79 : vector<8x1xf32> to vector<8x8xf32>
    %81 = arith.subf %77, %80 : vector<8x8xf32>
    %82 = math.exp %81 : vector<8x8xf32>
    %cst_28 = arith.constant dense<0.000000e+00> : vector<8xf32>
    %83 = vector.multi_reduction <add>, %82, %cst_28 [1] : vector<8x8xf32> to vector<8xf32>
    %84 = vector.shape_cast %83 : vector<8xf32> to vector<8x1xf32>
    %85 = tpu.reciprocal %84 {approx = true} : vector<8x1xf32> -> vector<8x1xf32>
    %86 = vector.broadcast %85 : vector<8x1xf32> to vector<8x8xf32>
    %87 = arith.mulf %82, %86 : vector<8x8xf32>
    %88 = arith.truncf %87 : vector<8x8xf32> to vector<8x8xbf16>
    %cst_29 = arith.constant dense<0.000000e+00> : vector<8x8xf32>
    %89 = tpu.matmul %88, %75, %cst_29 {dimension_numbers = #tpu.dot_dimension_numbers<[1], [0], [0], [1], [0, 0, 1, 1], [], []>} : vector<8x8xbf16>, vector<8x8xbf16>, vector<8x8xf32> -> vector<8x8xf32>
    %90 = vector.extract_strided_slice %38 {offsets = [0, 24], sizes = [8, 8], strides = [1, 1]} : vector<8x96xbf16> to vector<8x8xbf16>
    %91 = vector.extract_strided_slice %38 {offsets = [0, 56], sizes = [8, 8], strides = [1, 1]} : vector<8x96xbf16> to vector<8x8xbf16>
    %92 = vector.extract_strided_slice %38 {offsets = [0, 88], sizes = [8, 8], strides = [1, 1]} : vector<8x96xbf16> to vector<8x8xbf16>
    "tpu.trace_start"() <{level = 10 : i32, message = "td,sd->ts"}> : () -> ()
    %cst_30 = arith.constant dense<0.000000e+00> : vector<8x8xf32>
    %93 = tpu.matmul %90, %91, %cst_30 {dimension_numbers = #tpu.dot_dimension_numbers<[1], [1], [0], [0], [0, 0, 1, 0], [], []>} : vector<8x8xbf16>, vector<8x8xbf16>, vector<8x8xf32> -> vector<8x8xf32>
    "tpu.trace_stop"() : () -> ()
    %94 = arith.addf %93, %7 : vector<8x8xf32>
    %cst_31 = arith.constant dense<0xFF800000> : vector<8xf32>
    %95 = vector.multi_reduction <maximumf>, %94, %cst_31 [1] : vector<8x8xf32> to vector<8xf32>
    %96 = vector.shape_cast %95 : vector<8xf32> to vector<8x1xf32>
    %97 = vector.broadcast %96 : vector<8x1xf32> to vector<8x8xf32>
    %98 = arith.subf %94, %97 : vector<8x8xf32>
    %99 = math.exp %98 : vector<8x8xf32>
    %cst_32 = arith.constant dense<0.000000e+00> : vector<8xf32>
    %100 = vector.multi_reduction <add>, %99, %cst_32 [1] : vector<8x8xf32> to vector<8xf32>
    %101 = vector.shape_cast %100 : vector<8xf32> to vector<8x1xf32>
    %102 = tpu.reciprocal %101 {approx = true} : vector<8x1xf32> -> vector<8x1xf32>
    %103 = vector.broadcast %102 : vector<8x1xf32> to vector<8x8xf32>
    %104 = arith.mulf %99, %103 : vector<8x8xf32>
    %105 = arith.truncf %104 : vector<8x8xf32> to vector<8x8xbf16>
    %cst_33 = arith.constant dense<0.000000e+00> : vector<8x8xf32>
    %106 = tpu.matmul %105, %92, %cst_33 {dimension_numbers = #tpu.dot_dimension_numbers<[1], [0], [0], [1], [0, 0, 1, 1], [], []>} : vector<8x8xbf16>, vector<8x8xbf16>, vector<8x8xf32> -> vector<8x8xf32>
    %107 = tpu.concatenate %55, %72, %89, %106 in 1 : vector<8x8xf32>, vector<8x8xf32>, vector<8x8xf32>, vector<8x8xf32> -> vector<8x32xf32>
    %108 = arith.truncf %107 : vector<8x32xf32> to vector<8x32xbf16>
    %c0_34 = arith.constant 0 : index
    %c0_35 = arith.constant 0 : index
    %c0_36 = arith.constant 0 : index
    %109 = vector.load %arg3[%c0_34, %c0_35, %c0_36] : memref<2x32x32xbf16, #tpu.memory_space<vmem>>, vector<1x32x32xbf16>
    %110 = vector.shape_cast %109 : vector<1x32x32xbf16> to vector<32x32xbf16>
    %cst_37 = arith.constant dense<0.000000e+00> : vector<8x32xf32>
    %111 = tpu.matmul %108, %110, %cst_37 {dimension_numbers = #tpu.dot_dimension_numbers<[1], [0], [0], [1], [0, 0, 1, 1], [], []>} : vector<8x32xbf16>, vector<32x32xbf16>, vector<8x32xf32> -> vector<8x32xf32>
    %c0_38 = arith.constant 0 : index
    %c0_39 = arith.constant 0 : index
    %c0_40 = arith.constant 0 : index
    %112 = vector.load %arg4[%c0_38, %c0_39, %c0_40] : memref<2x1x32xf32, #tpu.memory_space<vmem>>, vector<1x1x32xf32>
    %113 = vector.shape_cast %112 : vector<1x1x32xf32> to vector<1x32xf32>
    %114 = vector.broadcast %113 : vector<1x32xf32> to vector<8x32xf32>
    %115 = arith.addf %111, %114 : vector<8x32xf32>
    %116 = arith.addf %1, %115 : vector<8x32xf32>
    %c0_41 = arith.constant 0 : index
    %c0_42 = arith.constant 0 : index
    %c0_43 = arith.constant 0 : index
    %117 = vector.load %arg11[%c0_41, %c0_42, %c0_43] : memref<2x1x32xf32, #tpu.memory_space<vmem>>, vector<1x1x32xf32>
    %118 = vector.shape_cast %117 : vector<1x1x32xf32> to vector<1x32xf32>
    %c0_44 = arith.constant 0 : index
    %c0_45 = arith.constant 0 : index
    %c0_46 = arith.constant 0 : index
    %119 = vector.load %arg12[%c0_44, %c0_45, %c0_46] : memref<2x1x32xf32, #tpu.memory_space<vmem>>, vector<1x1x32xf32>
    %120 = vector.shape_cast %119 : vector<1x1x32xf32> to vector<1x32xf32>
    %cst_47 = arith.constant dense<0.000000e+00> : vector<8xf32>
    %121 = vector.multi_reduction <add>, %116, %cst_47 [1] : vector<8x32xf32> to vector<8xf32>
    %122 = vector.shape_cast %121 : vector<8xf32> to vector<8x1xf32>
    %cst_48 = arith.constant 3.200000e+01 : f32
    %123 = vector.broadcast %cst_48 : f32 to vector<8x1xf32>
    %124 = arith.divf %122, %123 : vector<8x1xf32>
    %125 = vector.broadcast %124 : vector<8x1xf32> to vector<8x32xf32>
    %126 = arith.subf %116, %125 : vector<8x32xf32>
    %127 = arith.mulf %126, %126 : vector<8x32xf32>
    %cst_49 = arith.constant dense<0.000000e+00> : vector<8xf32>
    %128 = vector.multi_reduction <add>, %127, %cst_49 [1] : vector<8x32xf32> to vector<8xf32>
    %129 = vector.shape_cast %128 : vector<8xf32> to vector<8x1xf32>
    %cst_50 = arith.constant 3.200000e+01 : f32
    %130 = vector.broadcast %cst_50 : f32 to vector<8x1xf32>
    %131 = arith.divf %129, %130 : vector<8x1xf32>
    %132 = vector.broadcast %124 : vector<8x1xf32> to vector<8x32xf32>
    %133 = arith.subf %116, %132 : vector<8x32xf32>
    %cst_51 = arith.constant 9.99999974E-6 : f32
    %134 = vector.broadcast %cst_51 : f32 to vector<8x1xf32>
    %135 = arith.addf %131, %134 : vector<8x1xf32>
    %136 = math.rsqrt %135 : vector<8x1xf32>
    %137 = vector.broadcast %136 : vector<8x1xf32> to vector<8x32xf32>
    %138 = arith.mulf %133, %137 : vector<8x32xf32>
    %139 = vector.broadcast %118 : vector<1x32xf32> to vector<8x32xf32>
    %140 = arith.mulf %138, %139 : vector<8x32xf32>
    %141 = vector.broadcast %120 : vector<1x32xf32> to vector<8x32xf32>
    %142 = arith.addf %140, %141 : vector<8x32xf32>
    %143 = arith.truncf %142 : vector<8x32xf32> to vector<8x32xbf16>
    %c0_52 = arith.constant 0 : index
    %c0_53 = arith.constant 0 : index
    %c0_54 = arith.constant 0 : index
    %144 = vector.load %arg5[%c0_52, %c0_53, %c0_54] : memref<2x32x128xbf16, #tpu.memory_space<vmem>>, vector<1x32x128xbf16>
    %145 = vector.shape_cast %144 : vector<1x32x128xbf16> to vector<32x128xbf16>
    %cst_55 = arith.constant dense<0.000000e+00> : vector<8x128xf32>
    %146 = tpu.matmul %143, %145, %cst_55 {dimension_numbers = #tpu.dot_dimension_numbers<[1], [0], [0], [1], [0, 0, 1, 1], [], []>} : vector<8x32xbf16>, vector<32x128xbf16>, vector<8x128xf32> -> vector<8x128xf32>
    %c0_56 = arith.constant 0 : index
    %c0_57 = arith.constant 0 : index
    %c0_58 = arith.constant 0 : index
    %147 = vector.load %arg6[%c0_56, %c0_57, %c0_58] : memref<2x1x128xf32, #tpu.memory_space<vmem>>, vector<1x1x128xf32>
    %148 = vector.shape_cast %147 : vector<1x1x128xf32> to vector<1x128xf32>
    %149 = vector.broadcast %148 : vector<1x128xf32> to vector<8x128xf32>
    %150 = arith.addf %146, %149 : vector<8x128xf32>
    %cst_59 = arith.constant 5.000000e-01 : f32
    %151 = vector.broadcast %cst_59 : f32 to vector<8x128xf32>
    %152 = arith.mulf %151, %150 : vector<8x128xf32>
    %cst_60 = arith.constant 4.471500e-02 : f32
    %153 = vector.broadcast %cst_60 : f32 to vector<8x128xf32>
    %154 = arith.mulf %153, %150 : vector<8x128xf32>
    %155 = arith.mulf %154, %150 : vector<8x128xf32>
    %156 = arith.mulf %155, %150 : vector<8x128xf32>
    %157 = arith.addf %150, %156 : vector<8x128xf32>
    %cst_61 = arith.constant 0.797884583 : f32
    %158 = vector.broadcast %cst_61 : f32 to vector<8x128xf32>
    %159 = arith.mulf %158, %157 : vector<8x128xf32>
    %160 = math.tanh %159 : vector<8x128xf32>
    %cst_62 = arith.constant 1.000000e+00 : f32
    %161 = vector.broadcast %cst_62 : f32 to vector<8x128xf32>
    %162 = arith.addf %161, %160 : vector<8x128xf32>
    %163 = arith.mulf %152, %162 : vector<8x128xf32>
    %164 = arith.truncf %163 : vector<8x128xf32> to vector<8x128xbf16>
    %c0_63 = arith.constant 0 : index
    %c0_64 = arith.constant 0 : index
    %c0_65 = arith.constant 0 : index
    %165 = vector.load %arg7[%c0_63, %c0_64, %c0_65] : memref<2x128x32xbf16, #tpu.memory_space<vmem>>, vector<1x128x32xbf16>
    %166 = vector.shape_cast %165 : vector<1x128x32xbf16> to vector<128x32xbf16>
    %cst_66 = arith.constant dense<0.000000e+00> : vector<8x32xf32>
    %167 = tpu.matmul %164, %166, %cst_66 {dimension_numbers = #tpu.dot_dimension_numbers<[1], [0], [0], [1], [0, 0, 1, 1], [], []>} : vector<8x128xbf16>, vector<128x32xbf16>, vector<8x32xf32> -> vector<8x32xf32>
    %c0_67 = arith.constant 0 : index
    %c0_68 = arith.constant 0 : index
    %c0_69 = arith.constant 0 : index
    %168 = vector.load %arg8[%c0_67, %c0_68, %c0_69] : memref<2x1x32xf32, #tpu.memory_space<vmem>>, vector<1x1x32xf32>
    %169 = vector.shape_cast %168 : vector<1x1x32xf32> to vector<1x32xf32>
    %170 = vector.broadcast %169 : vector<1x32xf32> to vector<8x32xf32>
    %171 = arith.addf %167, %170 : vector<8x32xf32>
    %172 = arith.addf %116, %171 : vector<8x32xf32>
    %c1 = arith.constant 1 : index
    %c0_70 = arith.constant 0 : index
    %c0_71 = arith.constant 0 : index
    %173 = vector.load %arg9[%c1, %c0_70, %c0_71] : memref<2x1x32xf32, #tpu.memory_space<vmem>>, vector<1x1x32xf32>
    %174 = vector.shape_cast %173 : vector<1x1x32xf32> to vector<1x32xf32>
    %c1_72 = arith.constant 1 : index
    %c0_73 = arith.constant 0 : index
    %c0_74 = arith.constant 0 : index
    %175 = vector.load %arg10[%c1_72, %c0_73, %c0_74] : memref<2x1x32xf32, #tpu.memory_space<vmem>>, vector<1x1x32xf32>
    %176 = vector.shape_cast %175 : vector<1x1x32xf32> to vector<1x32xf32>
    %cst_75 = arith.constant dense<0.000000e+00> : vector<8xf32>
    %177 = vector.multi_reduction <add>, %172, %cst_75 [1] : vector<8x32xf32> to vector<8xf32>
    %178 = vector.shape_cast %177 : vector<8xf32> to vector<8x1xf32>
    %cst_76 = arith.constant 3.200000e+01 : f32
    %179 = vector.broadcast %cst_76 : f32 to vector<8x1xf32>
    %180 = arith.divf %178, %179 : vector<8x1xf32>
    %181 = vector.broadcast %180 : vector<8x1xf32> to vector<8x32xf32>
    %182 = arith.subf %172, %181 : vector<8x32xf32>
    %183 = arith.mulf %182, %182 : vector<8x32xf32>
    %cst_77 = arith.constant dense<0.000000e+00> : vector<8xf32>
    %184 = vector.multi_reduction <add>, %183, %cst_77 [1] : vector<8x32xf32> to vector<8xf32>
    %185 = vector.shape_cast %184 : vector<8xf32> to vector<8x1xf32>
    %cst_78 = arith.constant 3.200000e+01 : f32
    %186 = vector.broadcast %cst_78 : f32 to vector<8x1xf32>
    %187 = arith.divf %185, %186 : vector<8x1xf32>
    %188 = vector.broadcast %180 : vector<8x1xf32> to vector<8x32xf32>
    %189 = arith.subf %172, %188 : vector<8x32xf32>
    %cst_79 = arith.constant 9.99999974E-6 : f32
    %190 = vector.broadcast %cst_79 : f32 to vector<8x1xf32>
    %191 = arith.addf %187, %190 : vector<8x1xf32>
    %192 = math.rsqrt %191 : vector<8x1xf32>
    %193 = vector.broadcast %192 : vector<8x1xf32> to vector<8x32xf32>
    %194 = arith.mulf %189, %193 : vector<8x32xf32>
    %195 = vector.broadcast %174 : vector<1x32xf32> to vector<8x32xf32>
    %196 = arith.mulf %194, %195 : vector<8x32xf32>
    %197 = vector.broadcast %176 : vector<1x32xf32> to vector<8x32xf32>
    %198 = arith.addf %196, %197 : vector<8x32xf32>
    %199 = arith.truncf %198 : vector<8x32xf32> to vector<8x32xbf16>
    %c1_80 = arith.constant 1 : index
    %c0_81 = arith.constant 0 : index
    %c0_82 = arith.constant 0 : index
    %200 = vector.load %arg2[%c1_80, %c0_81, %c0_82] : memref<2x32x96xbf16, #tpu.memory_space<vmem>>, vector<1x32x96xbf16>
    %201 = vector.shape_cast %200 : vector<1x32x96xbf16> to vector<32x96xbf16>
    %cst_83 = arith.constant dense<0.000000e+00> : vector<8x96xf32>
    %202 = tpu.matmul %199, %201, %cst_83 {dimension_numbers = #tpu.dot_dimension_numbers<[1], [0], [0], [1], [0, 0, 1, 1], [], []>} : vector<8x32xbf16>, vector<32x96xbf16>, vector<8x96xf32> -> vector<8x96xf32>
    %203 = arith.truncf %202 : vector<8x96xf32> to vector<8x96xbf16>
    %204 = vector.extract_strided_slice %203 {offsets = [0, 0], sizes = [8, 8], strides = [1, 1]} : vector<8x96xbf16> to vector<8x8xbf16>
    %205 = vector.extract_strided_slice %203 {offsets = [0, 32], sizes = [8, 8], strides = [1, 1]} : vector<8x96xbf16> to vector<8x8xbf16>
    %206 = vector.extract_strided_slice %203 {offsets = [0, 64], sizes = [8, 8], strides = [1, 1]} : vector<8x96xbf16> to vector<8x8xbf16>
    "tpu.trace_start"() <{level = 10 : i32, message = "td,sd->ts"}> : () -> ()
    %cst_84 = arith.constant dense<0.000000e+00> : vector<8x8xf32>
    %207 = tpu.matmul %204, %205, %cst_84 {dimension_numbers = #tpu.dot_dimension_numbers<[1], [1], [0], [0], [0, 0, 1, 0], [], []>} : vector<8x8xbf16>, vector<8x8xbf16>, vector<8x8xf32> -> vector<8x8xf32>
    "tpu.trace_stop"() : () -> ()
    %208 = arith.addf %207, %7 : vector<8x8xf32>
    %cst_85 = arith.constant dense<0xFF800000> : vector<8xf32>
    %209 = vector.multi_reduction <maximumf>, %208, %cst_85 [1] : vector<8x8xf32> to vector<8xf32>
    %210 = vector.shape_cast %209 : vector<8xf32> to vector<8x1xf32>
    %211 = vector.broadcast %210 : vector<8x1xf32> to vector<8x8xf32>
    %212 = arith.subf %208, %211 : vector<8x8xf32>
    %213 = math.exp %212 : vector<8x8xf32>
    %cst_86 = arith.constant dense<0.000000e+00> : vector<8xf32>
    %214 = vector.multi_reduction <add>, %213, %cst_86 [1] : vector<8x8xf32> to vector<8xf32>
    %215 = vector.shape_cast %214 : vector<8xf32> to vector<8x1xf32>
    %216 = tpu.reciprocal %215 {approx = true} : vector<8x1xf32> -> vector<8x1xf32>
    %217 = vector.broadcast %216 : vector<8x1xf32> to vector<8x8xf32>
    %218 = arith.mulf %213, %217 : vector<8x8xf32>
    %219 = arith.truncf %218 : vector<8x8xf32> to vector<8x8xbf16>
    %cst_87 = arith.constant dense<0.000000e+00> : vector<8x8xf32>
    %220 = tpu.matmul %219, %206, %cst_87 {dimension_numbers = #tpu.dot_dimension_numbers<[1], [0], [0], [1], [0, 0, 1, 1], [], []>} : vector<8x8xbf16>, vector<8x8xbf16>, vector<8x8xf32> -> vector<8x8xf32>
    %221 = vector.extract_strided_slice %203 {offsets = [0, 8], sizes = [8, 8], strides = [1, 1]} : vector<8x96xbf16> to vector<8x8xbf16>
    %222 = vector.extract_strided_slice %203 {offsets = [0, 40], sizes = [8, 8], strides = [1, 1]} : vector<8x96xbf16> to vector<8x8xbf16>
    %223 = vector.extract_strided_slice %203 {offsets = [0, 72], sizes = [8, 8], strides = [1, 1]} : vector<8x96xbf16> to vector<8x8xbf16>
    "tpu.trace_start"() <{level = 10 : i32, message = "td,sd->ts"}> : () -> ()
    %cst_88 = arith.constant dense<0.000000e+00> : vector<8x8xf32>
    %224 = tpu.matmul %221, %222, %cst_88 {dimension_numbers = #tpu.dot_dimension_numbers<[1], [1], [0], [0], [0, 0, 1, 0], [], []>} : vector<8x8xbf16>, vector<8x8xbf16>, vector<8x8xf32> -> vector<8x8xf32>
    "tpu.trace_stop"() : () -> ()
    %225 = arith.addf %224, %7 : vector<8x8xf32>
    %cst_89 = arith.constant dense<0xFF800000> : vector<8xf32>
    %226 = vector.multi_reduction <maximumf>, %225, %cst_89 [1] : vector<8x8xf32> to vector<8xf32>
    %227 = vector.shape_cast %226 : vector<8xf32> to vector<8x1xf32>
    %228 = vector.broadcast %227 : vector<8x1xf32> to vector<8x8xf32>
    %229 = arith.subf %225, %228 : vector<8x8xf32>
    %230 = math.exp %229 : vector<8x8xf32>
    %cst_90 = arith.constant dense<0.000000e+00> : vector<8xf32>
    %231 = vector.multi_reduction <add>, %230, %cst_90 [1] : vector<8x8xf32> to vector<8xf32>
    %232 = vector.shape_cast %231 : vector<8xf32> to vector<8x1xf32>
    %233 = tpu.reciprocal %232 {approx = true} : vector<8x1xf32> -> vector<8x1xf32>
    %234 = vector.broadcast %233 : vector<8x1xf32> to vector<8x8xf32>
    %235 = arith.mulf %230, %234 : vector<8x8xf32>
    %236 = arith.truncf %235 : vector<8x8xf32> to vector<8x8xbf16>
    %cst_91 = arith.constant dense<0.000000e+00> : vector<8x8xf32>
    %237 = tpu.matmul %236, %223, %cst_91 {dimension_numbers = #tpu.dot_dimension_numbers<[1], [0], [0], [1], [0, 0, 1, 1], [], []>} : vector<8x8xbf16>, vector<8x8xbf16>, vector<8x8xf32> -> vector<8x8xf32>
    %238 = vector.extract_strided_slice %203 {offsets = [0, 16], sizes = [8, 8], strides = [1, 1]} : vector<8x96xbf16> to vector<8x8xbf16>
    %239 = vector.extract_strided_slice %203 {offsets = [0, 48], sizes = [8, 8], strides = [1, 1]} : vector<8x96xbf16> to vector<8x8xbf16>
    %240 = vector.extract_strided_slice %203 {offsets = [0, 80], sizes = [8, 8], strides = [1, 1]} : vector<8x96xbf16> to vector<8x8xbf16>
    "tpu.trace_start"() <{level = 10 : i32, message = "td,sd->ts"}> : () -> ()
    %cst_92 = arith.constant dense<0.000000e+00> : vector<8x8xf32>
    %241 = tpu.matmul %238, %239, %cst_92 {dimension_numbers = #tpu.dot_dimension_numbers<[1], [1], [0], [0], [0, 0, 1, 0], [], []>} : vector<8x8xbf16>, vector<8x8xbf16>, vector<8x8xf32> -> vector<8x8xf32>
    "tpu.trace_stop"() : () -> ()
    %242 = arith.addf %241, %7 : vector<8x8xf32>
    %cst_93 = arith.constant dense<0xFF800000> : vector<8xf32>
    %243 = vector.multi_reduction <maximumf>, %242, %cst_93 [1] : vector<8x8xf32> to vector<8xf32>
    %244 = vector.shape_cast %243 : vector<8xf32> to vector<8x1xf32>
    %245 = vector.broadcast %244 : vector<8x1xf32> to vector<8x8xf32>
    %246 = arith.subf %242, %245 : vector<8x8xf32>
    %247 = math.exp %246 : vector<8x8xf32>
    %cst_94 = arith.constant dense<0.000000e+00> : vector<8xf32>
    %248 = vector.multi_reduction <add>, %247, %cst_94 [1] : vector<8x8xf32> to vector<8xf32>
    %249 = vector.shape_cast %248 : vector<8xf32> to vector<8x1xf32>
    %250 = tpu.reciprocal %249 {approx = true} : vector<8x1xf32> -> vector<8x1xf32>
    %251 = vector.broadcast %250 : vector<8x1xf32> to vector<8x8xf32>
    %252 = arith.mulf %247, %251 : vector<8x8xf32>
    %253 = arith.truncf %252 : vector<8x8xf32> to vector<8x8xbf16>
    %cst_95 = arith.constant dense<0.000000e+00> : vector<8x8xf32>
    %254 = tpu.matmul %253, %240, %cst_95 {dimension_numbers = #tpu.dot_dimension_numbers<[1], [0], [0], [1], [0, 0, 1, 1], [], []>} : vector<8x8xbf16>, vector<8x8xbf16>, vector<8x8xf32> -> vector<8x8xf32>
    %255 = vector.extract_strided_slice %203 {offsets = [0, 24], sizes = [8, 8], strides = [1, 1]} : vector<8x96xbf16> to vector<8x8xbf16>
    %256 = vector.extract_strided_slice %203 {offsets = [0, 56], sizes = [8, 8], strides = [1, 1]} : vector<8x96xbf16> to vector<8x8xbf16>
    %257 = vector.extract_strided_slice %203 {offsets = [0, 88], sizes = [8, 8], strides = [1, 1]} : vector<8x96xbf16> to vector<8x8xbf16>
    "tpu.trace_start"() <{level = 10 : i32, message = "td,sd->ts"}> : () -> ()
    %cst_96 = arith.constant dense<0.000000e+00> : vector<8x8xf32>
    %258 = tpu.matmul %255, %256, %cst_96 {dimension_numbers = #tpu.dot_dimension_numbers<[1], [1], [0], [0], [0, 0, 1, 0], [], []>} : vector<8x8xbf16>, vector<8x8xbf16>, vector<8x8xf32> -> vector<8x8xf32>
    "tpu.trace_stop"() : () -> ()
    %259 = arith.addf %258, %7 : vector<8x8xf32>
    %cst_97 = arith.constant dense<0xFF800000> : vector<8xf32>
    %260 = vector.multi_reduction <maximumf>, %259, %cst_97 [1] : vector<8x8xf32> to vector<8xf32>
    %261 = vector.shape_cast %260 : vector<8xf32> to vector<8x1xf32>
    %262 = vector.broadcast %261 : vector<8x1xf32> to vector<8x8xf32>
    %263 = arith.subf %259, %262 : vector<8x8xf32>
    %264 = math.exp %263 : vector<8x8xf32>
    %cst_98 = arith.constant dense<0.000000e+00> : vector<8xf32>
    %265 = vector.multi_reduction <add>, %264, %cst_98 [1] : vector<8x8xf32> to vector<8xf32>
    %266 = vector.shape_cast %265 : vector<8xf32> to vector<8x1xf32>
    %267 = tpu.reciprocal %266 {approx = true} : vector<8x1xf32> -> vector<8x1xf32>
    %268 = vector.broadcast %267 : vector<8x1xf32> to vector<8x8xf32>
    %269 = arith.mulf %264, %268 : vector<8x8xf32>
    %270 = arith.truncf %269 : vector<8x8xf32> to vector<8x8xbf16>
    %cst_99 = arith.constant dense<0.000000e+00> : vector<8x8xf32>
    %271 = tpu.matmul %270, %257, %cst_99 {dimension_numbers = #tpu.dot_dimension_numbers<[1], [0], [0], [1], [0, 0, 1, 1], [], []>} : vector<8x8xbf16>, vector<8x8xbf16>, vector<8x8xf32> -> vector<8x8xf32>
    %272 = tpu.concatenate %220, %237, %254, %271 in 1 : vector<8x8xf32>, vector<8x8xf32>, vector<8x8xf32>, vector<8x8xf32> -> vector<8x32xf32>
    %273 = arith.truncf %272 : vector<8x32xf32> to vector<8x32xbf16>
    %c1_100 = arith.constant 1 : index
    %c0_101 = arith.constant 0 : index
    %c0_102 = arith.constant 0 : index
    %274 = vector.load %arg3[%c1_100, %c0_101, %c0_102] : memref<2x32x32xbf16, #tpu.memory_space<vmem>>, vector<1x32x32xbf16>
    %275 = vector.shape_cast %274 : vector<1x32x32xbf16> to vector<32x32xbf16>
    %cst_103 = arith.constant dense<0.000000e+00> : vector<8x32xf32>
    %276 = tpu.matmul %273, %275, %cst_103 {dimension_numbers = #tpu.dot_dimension_numbers<[1], [0], [0], [1], [0, 0, 1, 1], [], []>} : vector<8x32xbf16>, vector<32x32xbf16>, vector<8x32xf32> -> vector<8x32xf32>
    %c1_104 = arith.constant 1 : index
    %c0_105 = arith.constant 0 : index
    %c0_106 = arith.constant 0 : index
    %277 = vector.load %arg4[%c1_104, %c0_105, %c0_106] : memref<2x1x32xf32, #tpu.memory_space<vmem>>, vector<1x1x32xf32>
    %278 = vector.shape_cast %277 : vector<1x1x32xf32> to vector<1x32xf32>
    %279 = vector.broadcast %278 : vector<1x32xf32> to vector<8x32xf32>
    %280 = arith.addf %276, %279 : vector<8x32xf32>
    %281 = arith.addf %172, %280 : vector<8x32xf32>
    %c1_107 = arith.constant 1 : index
    %c0_108 = arith.constant 0 : index
    %c0_109 = arith.constant 0 : index
    %282 = vector.load %arg11[%c1_107, %c0_108, %c0_109] : memref<2x1x32xf32, #tpu.memory_space<vmem>>, vector<1x1x32xf32>
    %283 = vector.shape_cast %282 : vector<1x1x32xf32> to vector<1x32xf32>
    %c1_110 = arith.constant 1 : index
    %c0_111 = arith.constant 0 : index
    %c0_112 = arith.constant 0 : index
    %284 = vector.load %arg12[%c1_110, %c0_111, %c0_112] : memref<2x1x32xf32, #tpu.memory_space<vmem>>, vector<1x1x32xf32>
    %285 = vector.shape_cast %284 : vector<1x1x32xf32> to vector<1x32xf32>
    %cst_113 = arith.constant dense<0.000000e+00> : vector<8xf32>
    %286 = vector.multi_reduction <add>, %281, %cst_113 [1] : vector<8x32xf32> to vector<8xf32>
    %287 = vector.shape_cast %286 : vector<8xf32> to vector<8x1xf32>
    %cst_114 = arith.constant 3.200000e+01 : f32
    %288 = vector.broadcast %cst_114 : f32 to vector<8x1xf32>
    %289 = arith.divf %287, %288 : vector<8x1xf32>
    %290 = vector.broadcast %289 : vector<8x1xf32> to vector<8x32xf32>
    %291 = arith.subf %281, %290 : vector<8x32xf32>
    %292 = arith.mulf %291, %291 : vector<8x32xf32>
    %cst_115 = arith.constant dense<0.000000e+00> : vector<8xf32>
    %293 = vector.multi_reduction <add>, %292, %cst_115 [1] : vector<8x32xf32> to vector<8xf32>
    %294 = vector.shape_cast %293 : vector<8xf32> to vector<8x1xf32>
    %cst_116 = arith.constant 3.200000e+01 : f32
    %295 = vector.broadcast %cst_116 : f32 to vector<8x1xf32>
    %296 = arith.divf %294, %295 : vector<8x1xf32>
    %297 = vector.broadcast %289 : vector<8x1xf32> to vector<8x32xf32>
    %298 = arith.subf %281, %297 : vector<8x32xf32>
    %cst_117 = arith.constant 9.99999974E-6 : f32
    %299 = vector.broadcast %cst_117 : f32 to vector<8x1xf32>
    %300 = arith.addf %296, %299 : vector<8x1xf32>
    %301 = math.rsqrt %300 : vector<8x1xf32>
    %302 = vector.broadcast %301 : vector<8x1xf32> to vector<8x32xf32>
    %303 = arith.mulf %298, %302 : vector<8x32xf32>
    %304 = vector.broadcast %283 : vector<1x32xf32> to vector<8x32xf32>
    %305 = arith.mulf %303, %304 : vector<8x32xf32>
    %306 = vector.broadcast %285 : vector<1x32xf32> to vector<8x32xf32>
    %307 = arith.addf %305, %306 : vector<8x32xf32>
    %308 = arith.truncf %307 : vector<8x32xf32> to vector<8x32xbf16>
    %c1_118 = arith.constant 1 : index
    %c0_119 = arith.constant 0 : index
    %c0_120 = arith.constant 0 : index
    %309 = vector.load %arg5[%c1_118, %c0_119, %c0_120] : memref<2x32x128xbf16, #tpu.memory_space<vmem>>, vector<1x32x128xbf16>
    %310 = vector.shape_cast %309 : vector<1x32x128xbf16> to vector<32x128xbf16>
    %cst_121 = arith.constant dense<0.000000e+00> : vector<8x128xf32>
    %311 = tpu.matmul %308, %310, %cst_121 {dimension_numbers = #tpu.dot_dimension_numbers<[1], [0], [0], [1], [0, 0, 1, 1], [], []>} : vector<8x32xbf16>, vector<32x128xbf16>, vector<8x128xf32> -> vector<8x128xf32>
    %c1_122 = arith.constant 1 : index
    %c0_123 = arith.constant 0 : index
    %c0_124 = arith.constant 0 : index
    %312 = vector.load %arg6[%c1_122, %c0_123, %c0_124] : memref<2x1x128xf32, #tpu.memory_space<vmem>>, vector<1x1x128xf32>
    %313 = vector.shape_cast %312 : vector<1x1x128xf32> to vector<1x128xf32>
    %314 = vector.broadcast %313 : vector<1x128xf32> to vector<8x128xf32>
    %315 = arith.addf %311, %314 : vector<8x128xf32>
    %cst_125 = arith.constant 5.000000e-01 : f32
    %316 = vector.broadcast %cst_125 : f32 to vector<8x128xf32>
    %317 = arith.mulf %316, %315 : vector<8x128xf32>
    %cst_126 = arith.constant 4.471500e-02 : f32
    %318 = vector.broadcast %cst_126 : f32 to vector<8x128xf32>
    %319 = arith.mulf %318, %315 : vector<8x128xf32>
    %320 = arith.mulf %319, %315 : vector<8x128xf32>
    %321 = arith.mulf %320, %315 : vector<8x128xf32>
    %322 = arith.addf %315, %321 : vector<8x128xf32>
    %cst_127 = arith.constant 0.797884583 : f32
    %323 = vector.broadcast %cst_127 : f32 to vector<8x128xf32>
    %324 = arith.mulf %323, %322 : vector<8x128xf32>
    %325 = math.tanh %324 : vector<8x128xf32>
    %cst_128 = arith.constant 1.000000e+00 : f32
    %326 = vector.broadcast %cst_128 : f32 to vector<8x128xf32>
    %327 = arith.addf %326, %325 : vector<8x128xf32>
    %328 = arith.mulf %317, %327 : vector<8x128xf32>
    %329 = arith.truncf %328 : vector<8x128xf32> to vector<8x128xbf16>
    %c1_129 = arith.constant 1 : index
    %c0_130 = arith.constant 0 : index
    %c0_131 = arith.constant 0 : index
    %330 = vector.load %arg7[%c1_129, %c0_130, %c0_131] : memref<2x128x32xbf16, #tpu.memory_space<vmem>>, vector<1x128x32xbf16>
    %331 = vector.shape_cast %330 : vector<1x128x32xbf16> to vector<128x32xbf16>
    %cst_132 = arith.constant dense<0.000000e+00> : vector<8x32xf32>
    %332 = tpu.matmul %329, %331, %cst_132 {dimension_numbers = #tpu.dot_dimension_numbers<[1], [0], [0], [1], [0, 0, 1, 1], [], []>} : vector<8x128xbf16>, vector<128x32xbf16>, vector<8x32xf32> -> vector<8x32xf32>
    %c1_133 = arith.constant 1 : index
    %c0_134 = arith.constant 0 : index
    %c0_135 = arith.constant 0 : index
    %333 = vector.load %arg8[%c1_133, %c0_134, %c0_135] : memref<2x1x32xf32, #tpu.memory_space<vmem>>, vector<1x1x32xf32>
    %334 = vector.shape_cast %333 : vector<1x1x32xf32> to vector<1x32xf32>
    %335 = vector.broadcast %334 : vector<1x32xf32> to vector<8x32xf32>
    %336 = arith.addf %332, %335 : vector<8x32xf32>
    %337 = arith.addf %281, %336 : vector<8x32xf32>
    %c0_136 = arith.constant 0 : index
    %c0_137 = arith.constant 0 : index
    %338 = vector.load %arg13[%c0_136, %c0_137] : memref<1x32xf32, #tpu.memory_space<vmem>>, vector<1x32xf32>
    %c0_138 = arith.constant 0 : index
    %c0_139 = arith.constant 0 : index
    %339 = vector.load %arg14[%c0_138, %c0_139] : memref<1x32xf32, #tpu.memory_space<vmem>>, vector<1x32xf32>
    %cst_140 = arith.constant dense<0.000000e+00> : vector<8xf32>
    %340 = vector.multi_reduction <add>, %337, %cst_140 [1] : vector<8x32xf32> to vector<8xf32>
    %341 = vector.shape_cast %340 : vector<8xf32> to vector<8x1xf32>
    %cst_141 = arith.constant 3.200000e+01 : f32
    %342 = vector.broadcast %cst_141 : f32 to vector<8x1xf32>
    %343 = arith.divf %341, %342 : vector<8x1xf32>
    %344 = vector.broadcast %343 : vector<8x1xf32> to vector<8x32xf32>
    %345 = arith.subf %337, %344 : vector<8x32xf32>
    %346 = arith.mulf %345, %345 : vector<8x32xf32>
    %cst_142 = arith.constant dense<0.000000e+00> : vector<8xf32>
    %347 = vector.multi_reduction <add>, %346, %cst_142 [1] : vector<8x32xf32> to vector<8xf32>
    %348 = vector.shape_cast %347 : vector<8xf32> to vector<8x1xf32>
    %cst_143 = arith.constant 3.200000e+01 : f32
    %349 = vector.broadcast %cst_143 : f32 to vector<8x1xf32>
    %350 = arith.divf %348, %349 : vector<8x1xf32>
    %351 = vector.broadcast %343 : vector<8x1xf32> to vector<8x32xf32>
    %352 = arith.subf %337, %351 : vector<8x32xf32>
    %cst_144 = arith.constant 9.99999974E-6 : f32
    %353 = vector.broadcast %cst_144 : f32 to vector<8x1xf32>
    %354 = arith.addf %350, %353 : vector<8x1xf32>
    %355 = math.rsqrt %354 : vector<8x1xf32>
    %356 = vector.broadcast %355 : vector<8x1xf32> to vector<8x32xf32>
    %357 = arith.mulf %352, %356 : vector<8x32xf32>
    %358 = vector.broadcast %338 : vector<1x32xf32> to vector<8x32xf32>
    %359 = arith.mulf %357, %358 : vector<8x32xf32>
    %360 = vector.broadcast %339 : vector<1x32xf32> to vector<8x32xf32>
    %361 = arith.addf %359, %360 : vector<8x32xf32>
    %362 = arith.truncf %361 : vector<8x32xf32> to vector<8x32xbf16>
    %c0_145 = arith.constant 0 : index
    %c0_146 = arith.constant 0 : index
    %363 = vector.load %arg15[%c0_145, %c0_146] : memref<32x128xbf16, #tpu.memory_space<vmem>>, vector<32x128xbf16>
    %cst_147 = arith.constant dense<0.000000e+00> : vector<8x128xf32>
    %364 = tpu.matmul %362, %363, %cst_147 {dimension_numbers = #tpu.dot_dimension_numbers<[1], [0], [0], [1], [0, 0, 1, 1], [], []>} : vector<8x32xbf16>, vector<32x128xbf16>, vector<8x128xf32> -> vector<8x128xf32>
    %c0_148 = arith.constant 0 : index
    %c0_149 = arith.constant 0 : index
    %c0_150 = arith.constant 0 : index
    %365 = vector.load %arg16[%c0_148, %c0_149, %c0_150] : memref<1x8x128xf32, #tpu.memory_space<vmem>>, vector<1x8x128xf32>
    %366 = vector.shape_cast %365 : vector<1x8x128xf32> to vector<8x128xf32>
    %367 = vector.shape_cast %364 : vector<8x128xf32> to vector<1x8x128xf32>
    tpu.vector_store %arg16[%c0_148, %c0_149, %c0_150], %367 {strides = array<i32>} : memref<1x8x128xf32, #tpu.memory_space<vmem>>, vector<1x8x128xf32>,
    return
  }
  func.func @transform_0(%arg0: i32) -> (i32, i32, i32) {
    %c0_i32 = arith.constant 0 : i32
    %c0_i32_0 = arith.constant 0 : i32
    %c0_i32_1 = arith.constant 0 : i32
    return %arg0, %c0_i32, %c0_i32_0 : i32, i32, i32
  }
  func.func @transform_1(%arg0: i32) -> (i32, i32, i32) {
    %c0_i32 = arith.constant 0 : i32
    %c0_i32_0 = arith.constant 0 : i32
    %c0_i32_1 = arith.constant 0 : i32
    %c0_i32_2 = arith.constant 0 : i32
    return %c0_i32, %c0_i32_0, %c0_i32_1 : i32, i32, i32
  }
  func.func @transform_2(%arg0: i32) -> (i32, i32, i32) {
    %c0_i32 = arith.constant 0 : i32
    %c0_i32_0 = arith.constant 0 : i32
    %c0_i32_1 = arith.constant 0 : i32
    %c0_i32_2 = arith.constant 0 : i32
    return %c0_i32, %c0_i32_0, %c0_i32_1 : i32, i32, i32
  }
  func.func @transform_3(%arg0: i32) -> (i32, i32, i32) {
    %c0_i32 = arith.constant 0 : i32
    %c0_i32_0 = arith.constant 0 : i32
    %c0_i32_1 = arith.constant 0 : i32
    %c0_i32_2 = arith.constant 0 : i32
    return %c0_i32, %c0_i32_0, %c0_i32_1 : i32, i32, i32
  }
  func.func @transform_4(%arg0: i32) -> (i32, i32, i32) {
    %c0_i32 = arith.constant 0 : i32
    %c0_i32_0 = arith.constant 0 : i32
    %c0_i32_1 = arith.constant 0 : i32
    %c0_i32_2 = arith.constant 0 : i32
    return %c0_i32, %c0_i32_0, %c0_i32_1 : i32, i32, i32
  }
  func.func @transform_5(%arg0: i32) -> (i32, i32, i32) {
    %c0_i32 = arith.constant 0 : i32
    %c0_i32_0 = arith.constant 0 : i32
    %c0_i32_1 = arith.constant 0 : i32
    %c0_i32_2 = arith.constant 0 : i32
    return %c0_i32, %c0_i32_0, %c0_i32_1 : i32, i32, i32
  }
  func.func @transform_6(%arg0: i32) -> (i32, i32, i32) {
    %c0_i32 = arith.constant 0 : i32
    %c0_i32_0 = arith.constant 0 : i32
    %c0_i32_1 = arith.constant 0 : i32
    %c0_i32_2 = arith.constant 0 : i32
    return %c0_i32, %c0_i32_0, %c0_i32_1 : i32, i32, i32
  }
  func.func @transform_7(%arg0: i32) -> (i32, i32, i32) {
    %c0_i32 = arith.constant 0 : i32
    %c0_i32_0 = arith.constant 0 : i32
    %c0_i32_1 = arith.constant 0 : i32
    %c0_i32_2 = arith.constant 0 : i32
    return %c0_i32, %c0_i32_0, %c0_i32_1 : i32, i32, i32
  }
  func.func @transform_8(%arg0: i32) -> (i32, i32, i32) {
    %c0_i32 = arith.constant 0 : i32
    %c0_i32_0 = arith.constant 0 : i32
    %c0_i32_1 = arith.constant 0 : i32
    %c0_i32_2 = arith.constant 0 : i32
    return %c0_i32, %c0_i32_0, %c0_i32_1 : i32, i32, i32
  }
  func.func @transform_9(%arg0: i32) -> (i32, i32, i32) {
    %c0_i32 = arith.constant 0 : i32
    %c0_i32_0 = arith.constant 0 : i32
    %c0_i32_1 = arith.constant 0 : i32
    %c0_i32_2 = arith.constant 0 : i32
    return %c0_i32, %c0_i32_0, %c0_i32_1 : i32, i32, i32
  }
  func.func @transform_10(%arg0: i32) -> (i32, i32, i32) {
    %c0_i32 = arith.constant 0 : i32
    %c0_i32_0 = arith.constant 0 : i32
    %c0_i32_1 = arith.constant 0 : i32
    %c0_i32_2 = arith.constant 0 : i32
    return %c0_i32, %c0_i32_0, %c0_i32_1 : i32, i32, i32
  }
  func.func @transform_11(%arg0: i32) -> (i32, i32, i32) {
    %c0_i32 = arith.constant 0 : i32
    %c0_i32_0 = arith.constant 0 : i32
    %c0_i32_1 = arith.constant 0 : i32
    %c0_i32_2 = arith.constant 0 : i32
    return %c0_i32, %c0_i32_0, %c0_i32_1 : i32, i32, i32
  }
  func.func @transform_12(%arg0: i32) -> (i32, i32) {
    %c0_i32 = arith.constant 0 : i32
    %c0_i32_0 = arith.constant 0 : i32
    %c0_i32_1 = arith.constant 0 : i32
    return %c0_i32, %c0_i32_0 : i32, i32
  }
  func.func @transform_13(%arg0: i32) -> (i32, i32) {
    %c0_i32 = arith.constant 0 : i32
    %c0_i32_0 = arith.constant 0 : i32
    %c0_i32_1 = arith.constant 0 : i32
    return %c0_i32, %c0_i32_0 : i32, i32
  }
  func.func @transform_14(%arg0: i32) -> (i32, i32) {
    %c0_i32 = arith.constant 0 : i32
    %c0_i32_0 = arith.constant 0 : i32
    %c0_i32_1 = arith.constant 0 : i32
    return %c0_i32, %c0_i32_0 : i32, i32
  }
  func.func @transform_15(%arg0: i32) -> (i32, i32, i32) {
    %c0_i32 = arith.constant 0 : i32
    %c0_i32_0 = arith.constant 0 : i32
    %c0_i32_1 = arith.constant 0 : i32
    return %arg0, %c0_i32, %c0_i32_0 : i32, i32, i32
  }
}

</mosaic_0001>

<bundles_post_ra>
// kernel: _lambda_.1
= control target key start
LH: loop header
LB: loop body
LE: loop exit
PB: predicated region body
PF: predicated region fallthrough
CT: control target
= control target key end

     0   :  { %s3503_s0 = inlined_call_operand.vmem [shape: f32[2,8,32], index: 0, kind: input, shape index: {}]   ;;  %s3504_s1 = inlined_call_operand.vmem [shape: bf16[2,32,96], index: 1, kind: input, shape index: {}]   ;;  %s3505_s2 = inlined_call_operand.vmem [shape: bf16[2,32,32], index: 2, kind: input, shape index: {}]   ;;  %s3506_s3 = inlined_call_operand.vmem [shape: f32[2,1,32], index: 3, kind: input, shape index: {}]   ;;  %s3507_s4 = inlined_call_operand.vmem [shape: bf16[2,32,128], index: 4, kind: input, shape index: {}]   ;;  %s3508_s5 = inlined_call_operand.vmem [shape: f32[2,1,128], index: 5, kind: input, shape index: {}]   ;;  %s3509_s6 = inlined_call_operand.vmem [shape: bf16[2,128,32], index: 6, kind: input, shape index: {}]   ;;  %s3510_s7 = inlined_call_operand.vmem [shape: f32[2,1,32], index: 7, kind: input, shape index: {}]   ;;  %s3511_s8 = inlined_call_operand.vmem [shape: f32[2,1,32], index: 8, kind: input, shape index: {}]   ;;  %s3512_s9 = inlined_call_operand.vmem [shape: f32[2,1,32], index: 9, kind: input, shape index: {}]   ;;  %s3513_s10 = inlined_call_operand.vmem [shape: f32[2,1,32], index: 10, kind: input, shape index: {}]   ;;  %s3514_s11 = inlined_call_operand.vmem [shape: f32[2,1,32], index: 11, kind: input, shape index: {}]   ;;  %s3515_s12 = inlined_call_operand.vmem [shape: f32[1,32], index: 12, kind: input, shape index: {}]   ;;  %s3516_s13 = inlined_call_operand.vmem [shape: f32[1,32], index: 13, kind: input, shape index: {}]   ;;  %s3517_s14 = inlined_call_operand.vmem [shape: bf16[32,128], index: 14, kind: input, shape index: {}]   ;;  %s3518_s15 = inlined_call_operand.hbm [shape: f32[2,8,128], index: 15, kind: output, shape index: {}]  }
   0x1   :  { %3533 = sst [smem:[#allocation6_spill]] %s3503_s0 }
   0x2   :  { %3534 = sst [smem:[#allocation7_spill]] %s3504_s1 }
   0x3   :  { %3535 = sst [smem:[#allocation8_spill]] %s3505_s2 }
   0x4   :  { %3536 = sst [smem:[#allocation9_spill]] %s3506_s3 }
   0x5   :  { %20 = vsyncpa [#allocation3], 0 }
   0x6   :  { %22 = vsyncpa [#allocation3 + $0x1], 0  ;;  %s3009_s18 = smov 0   ;;  %s3011_s19 = smov 0  }
   0x7   :  { %s3013_s20 = smov 0   ;;  %s3015_s21 = smov 0  }
   0x8 LB: > { %s3030_s22 = sadd.s32 4294967295, %s2909_s21   ;;  %s2338_s23 = sadd.s32 4294967294, %s2909_s21   ;;  %s2909_s21 = sphi %s3015_s21, %s3562_s21   ;;  %s2905_s20 = sphi %s3013_s20, %s3561_s20   ;;  %s2901_s19 = sphi %s3011_s19, %s3560_s19   ;;  %s2897_s18 = sphi %s3009_s18, %s3559_s18  }
   0x9   : > { %s3034_s24 = sadd.s32 1, %s2909_s21   ;;  %s355_s25 = sadd.s32 1, %s2905_s20 }
   0xa   : > { %s352_s26 = ssub.s32 %s2909_s21, %s3034_s24  ;;  %p365_p0 = scmp.ne.s32.totalorder %s2905_s20, %s2901_s19 }
   0xb   : > { %p353_p1 = scmp.eq.s32.totalorder %s352_s26, 0  ;;  %p366_p2 = scmp.eq.s32.totalorder %s3030_s22, 1 }
   0xc   : > { %p371_p3 = scmp.ne.s32.totalorder %s2901_s19, %s2897_s18  ;;  %p372_p4 = scmp.eq.s32.totalorder %s2338_s23, 1 }
   0xd   : > { %s3045_s27 = scalar_select %p353_p1, %s2905_s20, %s355_s25  }
   0xe   : > { %p3047_p5 = por %p366_p2, %p365_p0  ;;  %p3051_p6 = por %p372_p4, %p371_p3 }
   0xf   : > { %3537 = sst [smem:[#allocation5_spill]] %s3045_s27  ;;  %p2341_p7 = scmp.ge.s32.totalorder %s2909_s21, 1 }
  0x10   : > { %p439_p8 = scmp.lt.s32.totalorder %s2909_s21, 3 }
  0x12   : > { %p440_p9 = pnand %p2341_p7, %p439_p8 }
  0x13   : > { %p486_p10 = scmp.lt.s32.totalorder (!%p440_p9), %s3030_s22, 1  ;;  %vm500_vm0 = vcmask (!%p440_p9), 261120   ;;  %s3540_s0 = sld [smem:[#allocation6_spill]] (!%p440_p9)  ;;  %v2911_v8 = vmov (!%p440_p9), 0.0   ;;  %vm2912_vm1 = vmmov (!%p440_p9), 0   ;;  %vm593_vm2 = vcmask (!%p440_p9), 64512  }
  0x14   : > { %443 = sbr.rel (%p440_p9) target bundleno = 6226 (0x1852), region = 80  ;;  %s3541_s1 = sld [smem:[#allocation7_spill]] (!%p440_p9)  ;;  %2523 = vmatprep.subr.bf16.mxu1 (!%p440_p9), %v2911_v8  ;;  %2527 = vmatprep.mubr.msk.bf16.mxu1 (!%p440_p9), %vm2912_vm1, %v2911_v8  ;;  %v2344_v14 = vld [vmem:[%s3511_s8] ss:$0 sm:$0xff] (!%p440_p9)  ;;  %v492_v36 = vlaneseq (!%p440_p9)  ;;  %v2920_v39 = vmov (!%p440_p9), -1e+30  }
  0x15   : > { %2537 = vmatprep.subr.bf16.mxu0 (!%p440_p9), %v2911_v8  ;;  %2539 = vmatprep.mubr.msk.bf16.mxu0 (!%p440_p9), %vm2912_vm1, %v2911_v8  ;;  %v2345_v16 = vld [vmem:[%s3512_s9] ss:$0 sm:$0xff] (!%p440_p9)  ;;  %s3529_s17 = smov (!%p440_p9), 96   ;;  %s3528_s23 = smov (!%p440_p9), 88   ;;  %vm657_vm4 = vcmask (!%p440_p9), 1043456   ;;  %vm1044_vm5 = vcmask (!%p440_p9), 130048  }
  0x16   : > { %s3527_s26 = smov (!%p440_p9), 112   ;;  %v493_v37 = vshrl.u32 (!%p440_p9), %v492_v36, 7  ;;  %v495_v38 = vand.u32 (!%p440_p9), 127, %v492_v36  ;;  %s3542_s2 = sld [smem:[#allocation8_spill]] (!%p440_p9)  ;;  %vm1046_vm6 = vcmask (!%p440_p9), 195584  }
  0x17   : > { %s3543_s3 = sld [smem:[#allocation9_spill]] (!%p440_p9)  ;;  %s3548_s27 = smov (!%p440_p9), 104  }
  0x18   : > { %vm496_vm3 = vcmp.le.s32.totalorder (!%p440_p9), %v495_v38, %v493_v37 }
  0x19   : > { %v3128_v40 = vsel (!%p440_p9), %vm496_vm3, 0.0, %v2920_v39 }
  0x1a   : > { %v2771_v7 = vld [vmem:[%s3541_s1] sm:$0xff] (!%p440_p9)   ;;  %v2772_v9 = vld [vmem:[%s3541_s1 + $0x8] sm:$0xff] (!%p440_p9)  }
  0x1b   : > { %s487_s30 = scalar_select %p486_p10, %s3030_s22, 1  ;;  %2524 = vmatpush3.bf16.msra.mxu1 %v2771_v7 }
  0x1c   : > { %2525 = vmatprep.subr.bf16.mxu1 %v2911_v8 }
  0x1d   : > { %s2343_s16 = sshll.u32 %s487_s30, 3  ;;  %s3520_s30 = smov 72  }
  0x1e   : > { %s489_s25 = scalar_lea.vmem %s3540_s0, %s2343_s16  ;;  %s3519_s16 = smov 120  }
  0x1f   : > { %v3062_v0 = vld [vmem:[%s489_s25] sm:$0xff]  ;;  %2526 = vmatpush3.bf16.msra.mxu1 %v2772_v9  ;;  %s3521_s25 = smov 80   ;;  %s3547_s0 = smov 112  }
  0x20   : > { %v501_v1 = vsel %vm500_vm0, %v3062_v0, 0.0  ;;  %2531 = vmatprep.subr.bf16.mxu1 %v2911_v8 }
  0x21   : > { %502 = vadd.xlane.f32.xlu0 %v501_v1 }
  0xae   : > { %v503_v2 = vpop.xlane.xlu0 %502 }
  0xaf   : > { %v505_v3 = vmul.f32 0.03125, %v503_v2 }
  0xb1   : > { %v506_v4 = vsub.f32 %v3062_v0, %v505_v3 }
  0xb3   : > { %v507_v5 = vmul.f32 %v506_v4, %v506_v4 }
  0xb5   : > { %v508_v6 = vsel %vm500_vm0, %v507_v5, 0.0 }
  0xb6   : > { %509 = vadd.xlane.f32.xlu0 %v508_v6 }
 0x143   : > { %v510_v10 = vpop.xlane.xlu0 %509 }
 0x144   : > { %v511_v11 = vmul.f32 0.03125, %v510_v10 }
 0x146   : > { %v512_v12 = vadd.f32 1e-05, %v511_v11 }
 0x148   : > { %2801 = vrsqrt.f32 %v512_v12 }
 0x152   : > { %v2802_v13 = vpop.eup %2801 }
 0x153   : > { %v514_v15 = vmul.f32 %v2802_v13, %v506_v4 }
 0x155   : > { %v521_v17 = vmul.f32 %v2344_v14, %v514_v15 }
 0x157   : > { %v528_v18 = vadd.f32 %v2345_v16, %v521_v17 }
 0x159   : > { %v529_v19 = vpack.c.bf16 %v528_v18, %v528_v18 }
 0x15b   : > { %2528 = vmatmul.mubr.msk.bf16.vlgmr.msra.gmra.mrb[0].mxu1 %vm500_vm0, %v529_v19 }
 0x15c   : > { %2533 = vmatprep.mubr.msk.bf16.mxu1 %vm2912_vm1, %v2911_v8 }
 0x22e   : > { %v583_v20 = vpop.f32.mrb[0].mxu1 }
 0x22f   : > { %v3091_v21 = vpack.c.bf16 %v583_v20, %v583_v20  ;;  %v2529_v22 = vpop.f32.mrb[1].mxu1 }
 0x230   : > { %v586_v23 = vpop.f32.mrb[2].mxu1 }
 0x231   : > { %701 = vrot.lane.b32.xlu0 %v3091_v21, %s3519_s16  ;;  %591 = vrot.lane.b32.xlu1 %v3091_v21, %s3529_s17  ;;  %v2530_v24 = vpop.f32.mrb[3].mxu1  ;;  %s3522_s16 = smov 104   ;;  %s3531_s17 = smov 16  }
 0x235   : > { %703 = vrot.lane.b32.xlu1 %v3091_v21, %s3528_s23  ;;  %s3546_s23 = smov 120  }
 0x239   : > { %813 = vrot.lane.b32.xlu1 %v3091_v21, %s3521_s25  ;;  %s3525_s25 = smov 56  }
 0x23d   : > { %811 = vrot.lane.b32.xlu1 %v3091_v21, %s3527_s26  ;;  %s3544_s26 = smov 96  }
 0x241   : > { %923 = vrot.lane.b32.xlu1 %v3091_v21, %s3520_s30  ;;  %s3523_s30 = smov 64  }
 0x245   : > { %921 = vrot.lane.b32.xlu1 %v3091_v21, %s3522_s16  ;;  %s3526_s16 = smov 48  }
 0x2a3   : > { %v592_v25 = vpop.permute.xlu1 %591  ;;  %v702_v30 = vpop.permute.xlu0 %701 }
 0x2a4   : > { %v598_v26 = vsel %vm593_vm2, %v592_v25, 0 }
 0x2a5   : > { %2532 = vmatpush3.bf16.xpose.msra.mxu1 %v598_v26 }
 0x2a6   : > { %2543 = vmatprep.subr.bf16.mxu1 %v2911_v8 }
 0x2a7   : > { %v704_v27 = vpop.permute.xlu1 %703 }
 0x2a8   : > { %v709_v28 = vsel %vm593_vm2, %v704_v27, 0 }
 0x2ab   : > { %v814_v29 = vpop.permute.xlu1 %813 }
 0x2ac   : > { %2534 = vmatmul.mubr.msk.bf16.vlgmr.msra.gmra.mrb[4].mxu1 %vm593_vm2, %v3091_v21  ;;  %v819_v32 = vsel %vm593_vm2, %v814_v29, 0 }
 0x2ad   : > { %2544 = vmatpush3.bf16.xpose.msra.mxu1 %v709_v28  ;;  %2545 = vmatprep.mubr.msk.bf16.mxu1 %vm2912_vm1, %v2911_v8 }
 0x2ae   : > { %2555 = vmatprep.subr.bf16.mxu1 %v2911_v8 }
 0x2af   : > { %v812_v31 = vpop.permute.xlu1 %811 }
 0x2b3   : > { %v924_v33 = vpop.permute.xlu1 %923 }
 0x2b4   : > { %2546 = vmatmul.mubr.msk.bf16.vlgmr.msra.gmra.mrb[8].mxu1 %vm593_vm2, %v702_v30  ;;  %v929_v34 = vsel %vm593_vm2, %v924_v33, 0 }
 0x2b5   : > { %2556 = vmatpush3.bf16.xpose.msra.mxu1 %v819_v32  ;;  %2557 = vmatprep.mubr.msk.bf16.mxu1 %vm2912_vm1, %v2911_v8 }
 0x2b6   : > { %2567 = vmatprep.subr.bf16.mxu1 %v2911_v8 }
 0x2b7   : > { %v922_v35 = vpop.permute.xlu1 %921 }
 0x2bc   : > { %2558 = vmatmul.mubr.msk.bf16.vlgmr.msra.gmra.mrb[12].mxu1 %vm593_vm2, %v812_v31 }
 0x2bd   : > { %2568 = vmatpush3.bf16.xpose.msra.mxu1 %v929_v34  ;;  %2569 = vmatprep.mubr.msk.bf16.mxu1 %vm2912_vm1, %v2911_v8 }
 0x2be   : > { %2579 = vmatprep.subr.bf16.mxu1 %v2911_v8 }
 0x2c4   : > { %2570 = vmatmul.mubr.msk.bf16.vlgmr.msra.gmra.mrb[16].mxu1 %vm593_vm2, %v922_v35 }
 0x2c5   : > { %2583 = vmatprep.mubr.msk.bf16.mxu1 %vm2912_vm1, %v2911_v8 }
 0x37f   : > { %v634_v41 = vpop.f32.mrb[4].mxu1 }
 0x380   : > { %v635_v42 = vadd.f32 %v634_v41, %v3128_v40  ;;  %v2535_v43 = vpop.f32.mrb[5].mxu1 }
 0x381   : > { %v637_v44 = vpop.f32.mrb[6].mxu1 }
 0x382   : > { %v2536_v45 = vpop.f32.mrb[7].mxu1  ;;  %v640_v46 = vsel %vm593_vm2, %v635_v42, -inf }
 0x383   : > { %641 = vmax.xlane.f32.xlu1 %v640_v46 }
 0x387   : > { %v745_v47 = vpop.f32.mrb[8].mxu1 }
 0x388   : > { %v746_v48 = vadd.f32 %v745_v47, %v3128_v40  ;;  %v2547_v49 = vpop.f32.mrb[9].mxu1 }
 0x389   : > { %v748_v50 = vpop.f32.mrb[10].mxu1 }
 0x38a   : > { %v2548_v51 = vpop.f32.mrb[11].mxu1  ;;  %v751_v52 = vsel %vm593_vm2, %v746_v48, -inf }
 0x38b   : > { %752 = vmax.xlane.f32.xlu0 %v751_v52 }
 0x38f   : > { %v855_v53 = vpop.f32.mrb[12].mxu1 }
 0x390   : > { %v856_v54 = vadd.f32 %v855_v53, %v3128_v40  ;;  %v2559_v55 = vpop.f32.mrb[13].mxu1 }
 0x391   : > { %v858_v56 = vpop.f32.mrb[14].mxu1 }
 0x392   : > { %v2560_v57 = vpop.f32.mrb[15].mxu1  ;;  %v861_v58 = vsel %vm593_vm2, %v856_v54, -inf  ;;  %v2773_v56 = vld [vmem:[%s3542_s2] sm:$0xff]  }
 0x393   : > { %862 = vmax.xlane.f32.xlu1 %v861_v58  ;;  %2580 = vmatpush3.bf16.msra.mxu1 %v2773_v56  ;;  %v2774_v57 = vld [vmem:[%s3542_s2 + $0x8] sm:$0xff]  }
 0x394   : > { %2581 = vmatprep.subr.bf16.mxu1 %v2911_v8 }
 0x397   : > { %v965_v59 = vpop.f32.mrb[16].mxu1  ;;  %2582 = vmatpush3.bf16.msra.mxu1 %v2774_v57 }
 0x398   : > { %v966_v60 = vadd.f32 %v965_v59, %v3128_v40  ;;  %v2571_v61 = vpop.f32.mrb[17].mxu1  ;;  %2595 = vmatprep.subr.bf16.mxu1 %v2911_v8 }
 0x399   : > { %v968_v62 = vpop.f32.mrb[18].mxu1 }
 0x39a   : > { %v2572_v63 = vpop.f32.mrb[19].mxu1  ;;  %v971_v1 = vsel %vm593_vm2, %v966_v60, -inf }
 0x39b   : > { %972 = vmax.xlane.f32.xlu0 %v971_v1 }
 0x410   : > { %v642_v2 = vpop.xlane.xlu1 %641 }
 0x411   : > { %v643_v3 = vsub.f32 %v635_v42, %v642_v2 }
 0x413   : > { %v644_v4 = vmul.f32 1.442695, %v643_v3 }
 0x415   : > { %2803 = vpow2.f32 %v644_v4 }
 0x418   : > { %v753_v5 = vpop.xlane.xlu0 %752 }
 0x419   : > { %v754_v6 = vsub.f32 %v746_v48, %v753_v5 }
 0x41b   : > { %v755_v7 = vmul.f32 1.442695, %v754_v6 }
 0x41d   : > { %2805 = vpow2.f32 %v755_v7 }
 0x41f   : > { %v2804_v9 = vpop.eup %2803 }
 0x420   : > { %v646_v10 = vsel %vm593_vm2, %v2804_v9, 0.0  ;;  %v863_v18 = vpop.xlane.xlu1 %862 }
 0x421   : > { %647 = vadd.xlane.f32.xlu1 %v646_v10  ;;  %v864_v19 = vsub.f32 %v856_v54, %v863_v18 }
 0x423   : > { %v865_v20 = vmul.f32 1.442695, %v864_v19 }
 0x427   : > { %v2806_v11 = vpop.eup %2805 }
 0x428   : > { %v973_v12 = vpop.xlane.xlu0 %972  ;;  %v757_v13 = vsel %vm593_vm2, %v2806_v11, 0.0 }
 0x429   : > { %v974_v14 = vsub.f32 %v966_v60, %v973_v12  ;;  %758 = vadd.xlane.f32.xlu0 %v757_v13 }
 0x42b   : > { %v975_v15 = vmul.f32 1.442695, %v974_v14 }
 0x42d   : > { %2807 = vpow2.f32 %v975_v15 }
 0x42e   : > { %2809 = vpow2.f32 %v865_v20 }
 0x432   : > { %652 = vrot.lane.b32.xlu1 %v3091_v21, %s3523_s30  ;;  %s3524_s30 = smov 40  }
 0x437   : > { %v2808_v16 = vpop.eup %2807 }
 0x438   : > { %v977_v17 = vsel %vm593_vm2, %v2808_v16, 0.0  ;;  %v2810_v22 = vpop.eup %2809 }
 0x439   : > { %978 = vadd.xlane.f32.xlu0 %v977_v17  ;;  %v867_v23 = vsel %vm593_vm2, %v2810_v22, 0.0 }
 0x44f   : > { %763 = vrot.lane.b32.xlu0 %v3091_v21, %s3525_s25  ;;  %s3549_s25 = smov 64  }
 0x456   : > { %868 = vadd.xlane.f32.xlu1 %v867_v23 }
 0x467   : > { %873 = vrot.lane.b32.xlu1 %v3091_v21, %s3526_s16  ;;  %s3530_s16 = smov 24  }
 0x46b   : > { %983 = vrot.lane.b32.xlu1 %v3091_v21, %s3524_s30  ;;  %s3532_s30 = smov 8  }
 0x4ae   : > { %v648_v24 = vpop.xlane.xlu1 %647 }
 0x4af   : > { %2811 = vrcp.f32 %v648_v24 }
 0x4b2   : > { %v653_v25 = vpop.permute.xlu1 %652 }
 0x4b3   : > { %v659_v26 = vsel %vm657_vm4, %v653_v25, 0  ;;  %v2775_v25 = vld [vmem:[%s3507_s4] sm:$0xff]  }
 0x4b4   : > { %2538 = vmatpush3.bf16.msra.mxu0 %v659_v26  ;;  %v2777_v26 = vld [vmem:[%s3509_s6] sm:$0xff]  }
 0x4b5   : > { %2549 = vmatprep.subr.bf16.mxu0 %v2911_v8 }
 0x4b6   : > { %v759_v28 = vpop.xlane.xlu0 %758 }
 0x4b7   : > { %2813 = vrcp.f32 %v759_v28 }
 0x4b9   : > { %v2812_v27 = vpop.eup %2811 }
 0x4ba   : > { %v650_v29 = vmul.f32 %v2812_v27, %v2804_v9 }
 0x4bc   : > { %v651_v30 = vpack.c.bf16 %v650_v29, %v650_v29 }
 0x4be   : > { %2540 = vmatmul.mubr.msk.bf16.vlgmr.msra.gmra.mrb[0].mxu0 %vm593_vm2, %v651_v30 }
 0x4bf   : > { %2551 = vmatprep.mubr.msk.bf16.mxu0 %vm2912_vm1, %v2911_v8 }
 0x4c1   : > { %v2814_v21 = vpop.eup %2813 }
 0x4c2   : > { %v761_v32 = vmul.f32 %v2814_v21, %v2806_v11  ;;  %v2357_v11 = vld [vmem:[%s3543_s3] ss:$0 sm:$0xff] }
 0x4c3   : > { %v2361_v21 = vld [vmem:[%s3513_s10] ss:$0 sm:$0xff] }
 0x4c4   : > { %v762_v35 = vpack.c.bf16 %v761_v32, %v761_v32  ;;  %v2362_v32 = vld [vmem:[%s3514_s11] ss:$0 sm:$0xff] }
 0x4c6   : > { %v979_v31 = vpop.xlane.xlu0 %978 }
 0x4ca   : > { %v764_v33 = vpop.permute.xlu0 %763 }
 0x4cb   : > { %v769_v34 = vsel %vm657_vm4, %v764_v33, 0 }
 0x4cc   : > { %2550 = vmatpush3.bf16.msra.mxu0 %v769_v34 }
 0x4cd   : > { %2561 = vmatprep.subr.bf16.mxu0 %v2911_v8 }
 0x4cf   : > { %2552 = vmatmul.mubr.msk.bf16.vlgmr.msra.gmra.mrb[4].mxu0 %vm593_vm2, %v762_v35 }
 0x4d0   : > { %2563 = vmatprep.mubr.msk.bf16.mxu0 %vm2912_vm1, %v2911_v8 }
 0x4e3   : > { %v869_v36 = vpop.xlane.xlu1 %868 }
 0x4e4   : > { %2815 = vrcp.f32 %v869_v36  ;;  %v2778_v36 = vld [vmem:[%s3509_s6 + $0x8] sm:$0xff]  }
 0x4e5   : > { %2817 = vrcp.f32 %v979_v31 }
 0x4e7   : > { %v874_v37 = vpop.permute.xlu1 %873 }
 0x4e8   : > { %v879_v38 = vsel %vm657_vm4, %v874_v37, 0  ;;  %v2779_v37 = vld [vmem:[%s3509_s6 + $0x10] sm:$0xff]  }
 0x4e9   : > { %2562 = vmatpush3.bf16.msra.mxu0 %v879_v38  ;;  %v2780_v38 = vld [vmem:[%s3509_s6 + $0x18] sm:$0xff]  }
 0x4ea   : > { %2573 = vmatprep.subr.bf16.mxu0 %v2911_v8 }
 0x4eb   : > { %v984_v42 = vpop.permute.xlu1 %983 }
 0x4ec   : > { %v989_v45 = vsel %vm657_vm4, %v984_v42, 0  ;;  %v2783_v42 = vld [vmem:[%s3509_s6 + $0x30] sm:$0xff]  }
 0x4ee   : > { %v2816_v39 = vpop.eup %2815 }
 0x4ef   : > { %v871_v41 = vmul.f32 %v2816_v39, %v2810_v22  ;;  %v2818_v44 = vpop.eup %2817  ;;  %v2781_v39 = vld [vmem:[%s3509_s6 + $0x20] sm:$0xff]  }
 0x4f0   : > { %v981_v46 = vmul.f32 %v2818_v44, %v2808_v16  ;;  %v2363_v44 = vld [vmem:[%s3508_s5] ss:$0 sm:$0xff] }
 0x4f1   : > { %v872_v43 = vpack.c.bf16 %v871_v41, %v871_v41  ;;  %v2782_v41 = vld [vmem:[%s3509_s6 + $0x28] sm:$0xff]  }
 0x4f2   : > { %v982_v47 = vpack.c.bf16 %v981_v46, %v981_v46 }
 0x4f3   : > { %2564 = vmatmul.mubr.msk.bf16.vlgmr.msra.gmra.mrb[8].mxu0 %vm593_vm2, %v872_v43  ;;  %v2784_v43 = vld [vmem:[%s3509_s6 + $0x38] sm:$0xff]  }
 0x4f4   : > { %2574 = vmatpush3.bf16.msra.mxu0 %v989_v45  ;;  %2575 = vmatprep.mubr.msk.bf16.mxu0 %vm2912_vm1, %v2911_v8 }
 0x4f5   : > { %2587 = vmatprep.subr.bf16.mxu0 %v2911_v8 }
 0x4fb   : > { %2576 = vmatmul.mubr.msk.bf16.vlgmr.msra.gmra.mrb[12].mxu0 %vm593_vm2, %v982_v47 }
 0x4fc   : > { %2591 = vmatprep.mubr.msk.bf16.mxu0 %vm2912_vm1, %v2911_v8  ;;  %2588 = vmatpush3.bf16.msra.mxu0 %v2775_v25 }
 0x4fd   : > { %2589 = vmatprep.subr.bf16.mxu0 %v2911_v8 }
 0x591   : > { %v695_v48 = vpop.f32.mrb[0].mxu0 }
 0x592   : > { %v2541_v49 = vpop.f32.mrb[1].mxu0 }
 0x593   : > { %v698_v50 = vpop.f32.mrb[2].mxu0 }
 0x594   : > { %v2542_v51 = vpop.f32.mrb[3].mxu0 }
 0x5a2   : > { %v805_v52 = vpop.f32.mrb[4].mxu0 }
 0x5a3   : > { %1032 = vrot.lane.b32.xlu0 %v805_v52, %s3532_s30  ;;  %v2553_v53 = vpop.f32.mrb[5].mxu0  ;;  %s3551_s30 = smov 72  }
 0x5a4   : > { %v808_v54 = vpop.f32.mrb[6].mxu0 }
 0x5a5   : > { %v2554_v55 = vpop.f32.mrb[7].mxu0 }
 0x5c6   : > { %v915_v58 = vpop.f32.mrb[8].mxu0 }
 0x5c7   : > { %1036 = vrot.lane.b32.xlu1 %v915_v58, %s3531_s17  ;;  %v2565_v59 = vpop.f32.mrb[9].mxu0  ;;  %s3550_s17 = smov 80  }
 0x5c8   : > { %v918_v60 = vpop.f32.mrb[10].mxu0 }
 0x5c9   : > { %v2566_v61 = vpop.f32.mrb[11].mxu0  ;;  %v2367_v60 = vld [vmem:[%s3510_s7] ss:$0 sm:$0xff] }
 0x5ce   : > { %v1025_v62 = vpop.f32.mrb[12].mxu0 }
 0x5cf   : > { %1040 = vrot.lane.b32.xlu0 %v1025_v62, %s3530_s16  ;;  %v2577_v63 = vpop.f32.mrb[13].mxu0  ;;  %s3545_s16 = smov 88  }
 0x5d0   : > { %v1028_v1 = vpop.f32.mrb[14].mxu0 }
 0x5d1   : > { %v2578_v2 = vpop.f32.mrb[15].mxu0 }
 0x615   : > { %v1033_v3 = vpop.permute.xlu0 %1032 }
 0x616   : > { %v1043_v5 = vsel %vm593_vm2, %v695_v48, %v1033_v3 }
 0x639   : > { %v1037_v4 = vpop.permute.xlu1 %1036 }
 0x63a   : > { %v1045_v6 = vsel %vm1044_vm5, %v1043_v5, %v1037_v4 }
 0x641   : > { %v1041_v7 = vpop.permute.xlu0 %1040 }
 0x642   : > { %v1047_v9 = vsel %vm1046_vm6, %v1045_v6, %v1041_v7 }
 0x643   : > { %v1048_v10 = vpack.c.bf16 %v1047_v9, %v1047_v9 }
 0x645   : > { %2584 = vmatmul.mubr.msk.bf16.vlgmr.msra.gmra.mrb[20].mxu1 %vm500_vm0, %v1048_v10 }
 0x646   : > { %2611 = vmatprep.mubr.msk.bf16.mxu1 %vm2912_vm1, %v2911_v8  ;;  %2596 = vmatpush3.bf16.msra.mxu1 %v2777_v26 }
 0x647   : > { %2597 = vmatprep.subr.bf16.mxu1 %v2911_v8 }
 0x64a   : > { %2598 = vmatpush3.bf16.msra.mxu1 %v2778_v36 }
 0x64b   : > { %2599 = vmatprep.subr.bf16.mxu1 %v2911_v8 }
 0x64e   : > { %2600 = vmatpush3.bf16.msra.mxu1 %v2779_v37 }
 0x64f   : > { %2601 = vmatprep.subr.bf16.mxu1 %v2911_v8 }
 0x652   : > { %2602 = vmatpush3.bf16.msra.mxu1 %v2780_v38 }
 0x653   : > { %2603 = vmatprep.subr.bf16.mxu1 %v2911_v8 }
 0x656   : > { %2604 = vmatpush3.bf16.msra.mxu1 %v2781_v39 }
 0x657   : > { %2605 = vmatprep.subr.bf16.mxu1 %v2911_v8 }
 0x65a   : > { %2606 = vmatpush3.bf16.msra.mxu1 %v2782_v41 }
 0x65b   : > { %2607 = vmatprep.subr.bf16.mxu1 %v2911_v8 }
 0x65e   : > { %2608 = vmatpush3.bf16.msra.mxu1 %v2783_v42 }
 0x65f   : > { %2609 = vmatprep.subr.bf16.mxu1 %v2911_v8 }
 0x662   : > { %2610 = vmatpush3.bf16.msra.mxu1 %v2784_v43 }
 0x663   : > { %2641 = vmatprep.subr.bf16.mxu1 %v2911_v8 }
 0x718   : > { %v1109_v12 = vpop.f32.mrb[20].mxu1 }
 0x719   : > { %v1110_v13 = vadd.f32 %v2357_v11, %v1109_v12  ;;  %v2585_v14 = vpop.f32.mrb[21].mxu1  ;;  %v2785_v11 = vld [vmem:[%s3541_s1 + $0x10] sm:$0xff]   ;;  %v2786_v12 = vld [vmem:[%s3541_s1 + $0x18] sm:$0xff]   ;;  %s2449_s1 = sshll.u32 %s3030_s22, 7  ;;  %s2928_s22 = smov [#allocation2]  }
 0x71a   : > { %v1112_v15 = vpop.f32.mrb[22].mxu1 }
 0x71b   : > { %v3191_v16 = vadd.f32 %v1110_v13, %v3062_v0  ;;  %v2586_v17 = vpop.f32.mrb[23].mxu1  ;;  %v2776_v0 = vld [vmem:[%s3507_s4 + $0x8] sm:$0xff]  }
 0x71c   : > { %2590 = vmatpush3.bf16.msra.mxu0 %v2776_v0  ;;  %v2378_v17 = vld [vmem:[%s3511_s8 + $0x1] ss:$0 sm:$0xff] }
 0x71d   : > { %v1118_v18 = vsel %vm500_vm0, %v3191_v16, 0.0  ;;  %2615 = vmatprep.subr.bf16.mxu0 %v2911_v8 }
 0x71e   : > { %1119 = vadd.xlane.f32.xlu1 %v1118_v18 }
 0x7ab   : > { %v1120_v19 = vpop.xlane.xlu1 %1119 }
 0x7ac   : > { %v1121_v20 = vmul.f32 0.03125, %v1120_v19  ;;  %v2379_v19 = vld [vmem:[%s3512_s9 + $0x1] ss:$0 sm:$0xff] }
 0x7ae   : > { %v1122_v22 = vsub.f32 %v3191_v16, %v1121_v20 }
 0x7b0   : > { %v1123_v23 = vmul.f32 %v1122_v22, %v1122_v22 }
 0x7b2   : > { %v1124_v24 = vsel %vm500_vm0, %v1123_v23, 0.0 }
 0x7b3   : > { %1125 = vadd.xlane.f32.xlu0 %v1124_v24 }
 0x840   : > { %v1126_v27 = vpop.xlane.xlu0 %1125 }
 0x841   : > { %v1127_v28 = vmul.f32 0.03125, %v1126_v27 }
 0x843   : > { %v1128_v29 = vadd.f32 1e-05, %v1127_v28 }
 0x845   : > { %2819 = vrsqrt.f32 %v1128_v29 }
 0x84f   : > { %v2820_v30 = vpop.eup %2819 }
 0x850   : > { %v1130_v31 = vmul.f32 %v2820_v30, %v1122_v22 }
 0x852   : > { %v1137_v33 = vmul.f32 %v2361_v21, %v1130_v31 }
 0x854   : > { %v1144_v34 = vadd.f32 %v2362_v32, %v1137_v33 }
 0x856   : > { %v1145_v35 = vpack.c.bf16 %v1144_v34, %v1144_v34 }
 0x858   : > { %2592 = vmatmul.mubr.msk.bf16.vlgmr.msra.gmra.mrb[16].mxu0 %vm500_vm0, %v1145_v35 }
 0x859   : > { %2619 = vmatprep.mubr.msk.bf16.mxu0 %vm2912_vm1, %v2911_v8  ;;  %2616 = vmatpush3.bf16.msra.mxu0 %v2785_v11 }
 0x85a   : > { %2617 = vmatprep.subr.bf16.mxu0 %v2911_v8 }
 0x85d   : > { %2618 = vmatpush3.bf16.msra.mxu0 %v2786_v12 }
 0x85e   : > { %2623 = vmatprep.subr.bf16.mxu0 %v2911_v8 }
 0x92b   : > { %v1206_v45 = vpop.f32.mrb[16].mxu0 }
 0x92c   : > { %v1207_v46 = vadd.f32 %v2363_v44, %v1206_v45  ;;  %v2593_v47 = vpop.f32.mrb[17].mxu0 }
 0x92d   : > { %v1209_v48 = vpop.f32.mrb[18].mxu0 }
 0x92e   : > { %v1213_v49 = vmul.f32 0.044715, %v1207_v46  ;;  %v2594_v50 = vpop.f32.mrb[19].mxu0  ;;  %v1212_v56 = vmul.f32 0.5, %v1207_v46 }
 0x930   : > { %v1214_v51 = vmul.f32 %v1213_v49, %v1207_v46 }
 0x932   : > { %v1215_v52 = vmul.f32 %v1214_v51, %v1207_v46 }
 0x934   : > { %v1216_v53 = vadd.f32 %v1215_v52, %v1207_v46 }
 0x936   : > { %v1217_v54 = vmul.f32 0.7978846, %v1216_v53 }
 0x938   : > { %2821 = vtanh.f32 %v1217_v54 }
 0x942   : > { %v2822_v55 = vpop.eup %2821 }
 0x943   : > { %v1219_v57 = vadd.f32 1.0, %v2822_v55 }
 0x945   : > { %v1220_v58 = vmul.f32 %v1219_v57, %v1212_v56 }
 0x947   : > { %v1221_v59 = vpack.c.bf16 %v1220_v58, %v1220_v58 }
 0x949   : > { %2612 = vmatmul.mubr.bf16.vlgmr.msra.gmra.mrb[24].mxu1 %v1221_v59 }
 0x94a   : > { %2643 = vmatprep.mubr.msk.bf16.mxu1 %vm2912_vm1, %v2911_v8 }
 0xa1c   : > { %v1327_v61 = vpop.f32.mrb[24].mxu1 }
 0xa1d   : > { %v1328_v62 = vadd.f32 %v2367_v60, %v1327_v61  ;;  %v2613_v63 = vpop.f32.mrb[25].mxu1 }
 0xa1e   : > { %v1330_v1 = vpop.f32.mrb[26].mxu1 }
 0xa1f   : > { %v3255_v2 = vadd.f32 %v1328_v62, %v3191_v16  ;;  %v2614_v3 = vpop.f32.mrb[27].mxu1 }
 0xa21   : > { %v1338_v4 = vsel %vm500_vm0, %v3255_v2, 0.0 }
 0xa22   : > { %1339 = vadd.xlane.f32.xlu0 %v1338_v4 }
 0xaaf   : > { %v1340_v5 = vpop.xlane.xlu0 %1339 }
 0xab0   : > { %v1341_v6 = vmul.f32 0.03125, %v1340_v5 }
 0xab2   : > { %v1342_v7 = vsub.f32 %v3255_v2, %v1341_v6 }
 0xab4   : > { %v1343_v9 = vmul.f32 %v1342_v7, %v1342_v7 }
 0xab6   : > { %v1344_v10 = vsel %vm500_vm0, %v1343_v9, 0.0 }
 0xab7   : > { %1345 = vadd.xlane.f32.xlu1 %v1344_v10 }
 0xb44   : > { %v1346_v13 = vpop.xlane.xlu1 %1345 }
 0xb45   : > { %v1347_v14 = vmul.f32 0.03125, %v1346_v13 }
 0xb47   : > { %v1348_v15 = vadd.f32 1e-05, %v1347_v14 }
 0xb49   : > { %2823 = vrsqrt.f32 %v1348_v15 }
 0xb53   : > { %v2824_v16 = vpop.eup %2823 }
 0xb54   : > { %v1350_v18 = vmul.f32 %v2824_v16, %v1342_v7 }
 0xb56   : > { %v1357_v20 = vmul.f32 %v2378_v17, %v1350_v18 }
 0xb58   : > { %v1364_v22 = vadd.f32 %v2379_v19, %v1357_v20 }
 0xb5a   : > { %v1365_v23 = vpack.c.bf16 %v1364_v22, %v1364_v22 }
 0xb5c   : > { %2620 = vmatmul.mubr.msk.bf16.vlgmr.msra.gmra.mrb[20].mxu0 %vm500_vm0, %v1365_v23 }
 0xb5d   : > { %2625 = vmatprep.mubr.msk.bf16.mxu0 %vm2912_vm1, %v2911_v8 }
 0xc2f   : > { %v1420_v24 = vpop.f32.mrb[20].mxu0 }
 0xc30   : > { %v3278_v25 = vpack.c.bf16 %v1420_v24, %v1420_v24  ;;  %v2621_v0 = vpop.f32.mrb[21].mxu0 }
 0xc31   : > { %v1423_v26 = vpop.f32.mrb[22].mxu0 }
 0xc32   : > { %1428 = vrot.lane.b32.xlu0 %v3278_v25, %s3544_s26  ;;  %v2622_v27 = vpop.f32.mrb[23].mxu0  ;;  %s3552_s26 = smov 48  }
 0xc36   : > { %1538 = vrot.lane.b32.xlu0 %v3278_v25, %s3545_s16  ;;  %s3553_s16 = smov 56  }
 0xc3a   : > { %1536 = vrot.lane.b32.xlu0 %v3278_v25, %s3546_s23  ;;  %s3554_s23 = smov 40  }
 0xc3e   : > { %1646 = vrot.lane.b32.xlu0 %v3278_v25, %s3547_s0 }
 0xc42   : > { %1756 = vrot.lane.b32.xlu0 %v3278_v25, %s3548_s27 }
 0xca4   : > { %v1429_v28 = vpop.permute.xlu0 %1428 }
 0xca5   : > { %v1434_v29 = vsel %vm593_vm2, %v1429_v28, 0 }
 0xca6   : > { %2624 = vmatpush3.bf16.xpose.msra.mxu0 %v1434_v29 }
 0xca7   : > { %2629 = vmatprep.subr.bf16.mxu0 %v2911_v8 }
 0xca8   : > { %v1539_v46 = vpop.permute.xlu0 %1538 }
 0xca9   : > { %v1544_v48 = vsel %vm593_vm2, %v1539_v46, 0 }
 0xcac   : > { %v1537_v50 = vpop.permute.xlu0 %1536 }
 0xcad   : > { %2626 = vmatmul.mubr.msk.bf16.vlgmr.msra.gmra.mrb[24].mxu0 %vm593_vm2, %v3278_v25 }
 0xcae   : > { %2631 = vmatprep.mubr.msk.bf16.mxu0 %vm2912_vm1, %v2911_v8 }
 0xcb0   : > { %v1647_v53 = vpop.permute.xlu0 %1646 }
 0xcb4   : > { %v1757_v55 = vpop.permute.xlu0 %1756 }
 0xd80   : > { %v1470_v30 = vpop.f32.mrb[24].mxu0 }
 0xd81   : > { %v1471_v21 = vadd.f32 %v1470_v30, %v3128_v40  ;;  %v2627_v31 = vpop.f32.mrb[25].mxu0 }
 0xd82   : > { %v1473_v32 = vpop.f32.mrb[26].mxu0 }
 0xd83   : > { %v2628_v33 = vpop.f32.mrb[27].mxu0  ;;  %v1476_v34 = vsel %vm593_vm2, %v1471_v21, -inf }
 0xd84   : > { %1477 = vmax.xlane.f32.xlu1 %v1476_v34 }
 0xe11   : > { %v1478_v35 = vpop.xlane.xlu1 %1477 }
 0xe12   : > { %v1479_v36 = vsub.f32 %v1471_v21, %v1478_v35 }
 0xe14   : > { %v1480_v37 = vmul.f32 1.442695, %v1479_v36 }
 0xe16   : > { %2825 = vpow2.f32 %v1480_v37 }
 0xe20   : > { %v2826_v38 = vpop.eup %2825 }
 0xe21   : > { %v1482_v39 = vsel %vm593_vm2, %v2826_v38, 0.0 }
 0xe22   : > { %1483 = vadd.xlane.f32.xlu1 %v1482_v39 }
 0xe33   : > { %1488 = vrot.lane.b32.xlu1 %v3278_v25, %s3549_s25  ;;  %s3555_s25 = smov 8  }
 0xe37   : > { %1648 = vrot.lane.b32.xlu1 %v3278_v25, %s3550_s17  ;;  %s3556_s17 = smov 16  }
 0xe3b   : > { %1758 = vrot.lane.b32.xlu1 %v3278_v25, %s3551_s30 }
 0xeaf   : > { %v1484_v41 = vpop.xlane.xlu1 %1483 }
 0xeb0   : > { %2827 = vrcp.f32 %v1484_v41 }
 0xeb3   : > { %v1489_v42 = vpop.permute.xlu1 %1488 }
 0xeb4   : > { %v1494_v43 = vsel %vm657_vm4, %v1489_v42, 0 }
 0xeb5   : > { %2630 = vmatpush3.bf16.msra.mxu0 %v1494_v43 }
 0xeb6   : > { %2635 = vmatprep.subr.bf16.mxu0 %v2911_v8 }
 0xeb7   : > { %v1649_v49 = vpop.permute.xlu1 %1648 }
 0xeb8   : > { %v1654_v51 = vsel %vm593_vm2, %v1649_v49, 0  ;;  %v2787_v49 = vld [vmem:[%s3542_s2 + $0x10] sm:$0xff]  }
 0xeba   : > { %v2828_v44 = vpop.eup %2827 }
 0xebb   : > { %v1486_v45 = vmul.f32 %v2828_v44, %v2826_v38  ;;  %v1759_v52 = vpop.permute.xlu1 %1758 }
 0xebc   : > { %v1764_v54 = vsel %vm593_vm2, %v1759_v52, 0 }
 0xebd   : > { %v1487_v47 = vpack.c.bf16 %v1486_v45, %v1486_v45 }
 0xebf   : > { %2632 = vmatmul.mubr.msk.bf16.vlgmr.msra.gmra.mrb[28].mxu0 %vm593_vm2, %v1487_v47 }
 0xec0   : > { %2636 = vmatpush3.bf16.xpose.msra.mxu0 %v1544_v48  ;;  %2637 = vmatprep.mubr.msk.bf16.mxu0 %vm2912_vm1, %v2911_v8 }
 0xec1   : > { %2647 = vmatprep.subr.bf16.mxu0 %v2911_v8 }
 0xec7   : > { %2638 = vmatmul.mubr.msk.bf16.vlgmr.msra.gmra.mrb[32].mxu0 %vm593_vm2, %v1537_v50 }
 0xec8   : > { %2648 = vmatpush3.bf16.xpose.msra.mxu0 %v1654_v51  ;;  %2649 = vmatprep.mubr.msk.bf16.mxu0 %vm2912_vm1, %v2911_v8 }
 0xec9   : > { %2659 = vmatprep.subr.bf16.mxu0 %v2911_v8 }
 0xecf   : > { %2650 = vmatmul.mubr.msk.bf16.vlgmr.msra.gmra.mrb[36].mxu0 %vm593_vm2, %v1647_v53 }
 0xed0   : > { %2660 = vmatpush3.bf16.xpose.msra.mxu0 %v1764_v54  ;;  %2661 = vmatprep.mubr.msk.bf16.mxu0 %vm2912_vm1, %v2911_v8 }
 0xed1   : > { %2671 = vmatprep.subr.bf16.mxu0 %v2911_v8 }
 0xed7   : > { %2662 = vmatmul.mubr.msk.bf16.vlgmr.msra.gmra.mrb[40].mxu0 %vm593_vm2, %v1757_v55 }
 0xed8   : > { %2675 = vmatprep.mubr.msk.bf16.mxu0 %vm2912_vm1, %v2911_v8  ;;  %2672 = vmatpush3.bf16.msra.mxu0 %v2787_v49 }
 0xed9   : > { %2673 = vmatprep.subr.bf16.mxu0 %v2911_v8 }
 0xf92   : > { %v3325_v56 = vpop.f32.mrb[28].mxu0 }
 0xf93   : > { %v2633_v57 = vpop.f32.mrb[29].mxu0 }
 0xf94   : > { %v1533_v58 = vpop.f32.mrb[30].mxu0 }
 0xf95   : > { %v2634_v59 = vpop.f32.mrb[31].mxu0 }
 0xf96   : > { %v2788_v59 = vld [vmem:[%s3542_s2 + $0x18] sm:$0xff]  }
 0xf97   : > { %2674 = vmatpush3.bf16.msra.mxu0 %v2788_v59 }
 0xf98   : > { %2687 = vmatprep.subr.bf16.mxu0 %v2911_v8 }
 0xf9a   : > { %v1580_v60 = vpop.f32.mrb[32].mxu0 }
 0xf9b   : > { %v1581_v61 = vadd.f32 %v1580_v60, %v3128_v40  ;;  %v2639_v62 = vpop.f32.mrb[33].mxu0 }
 0xf9c   : > { %v1583_v63 = vpop.f32.mrb[34].mxu0 }
 0xf9d   : > { %v2640_v1 = vpop.f32.mrb[35].mxu0  ;;  %v1586_v3 = vsel %vm593_vm2, %v1581_v61, -inf }
 0xf9e   : > { %1587 = vmax.xlane.f32.xlu1 %v1586_v3 }
 0xfa2   : > { %v1690_v4 = vpop.f32.mrb[36].mxu0 }
 0xfa3   : > { %v1691_v5 = vadd.f32 %v1690_v4, %v3128_v40  ;;  %v2651_v6 = vpop.f32.mrb[37].mxu0 }
 0xfa4   : > { %v1693_v7 = vpop.f32.mrb[38].mxu0 }
 0xfa5   : > { %v2652_v9 = vpop.f32.mrb[39].mxu0  ;;  %v1696_v10 = vsel %vm593_vm2, %v1691_v5, -inf }
 0xfa6   : > { %1697 = vmax.xlane.f32.xlu0 %v1696_v10  ;;  %v2400_v10 = vld [vmem:[%s3543_s3 + $0x1] ss:$0 sm:$0xff] }
 0xfaa   : > { %v1800_v11 = vpop.f32.mrb[40].mxu0 }
 0xfab   : > { %v1801_v12 = vadd.f32 %v1800_v11, %v3128_v40  ;;  %v2663_v13 = vpop.f32.mrb[41].mxu0 }
 0xfac   : > { %v1803_v14 = vpop.f32.mrb[42].mxu0 }
 0xfad   : > { %v2664_v15 = vpop.f32.mrb[43].mxu0  ;;  %v1806_v16 = vsel %vm593_vm2, %v1801_v12, -inf }
 0xfae   : > { %1807 = vmax.xlane.f32.xlu0 %v1806_v16 }
0x102b   : > { %v1588_v17 = vpop.xlane.xlu1 %1587 }
0x102c   : > { %v1589_v18 = vsub.f32 %v1581_v61, %v1588_v17 }
0x102e   : > { %v1590_v19 = vmul.f32 1.442695, %v1589_v18 }
0x1030   : > { %2829 = vpow2.f32 %v1590_v19 }
0x1033   : > { %v1698_v20 = vpop.xlane.xlu0 %1697 }
0x1034   : > { %v1699_v22 = vsub.f32 %v1691_v5, %v1698_v20 }
0x1036   : > { %v1700_v23 = vmul.f32 1.442695, %v1699_v22 }
0x1038   : > { %2831 = vpow2.f32 %v1700_v23  ;;  %v2789_v23 = vld [vmem:[%s3507_s4 + $0x10] sm:$0xff]  }
0x103a   : > { %v2830_v24 = vpop.eup %2829 }
0x103b   : > { %v1592_v0 = vsel %vm593_vm2, %v2830_v24, 0.0  ;;  %v1808_v27 = vpop.xlane.xlu0 %1807 }
0x103c   : > { %1593 = vadd.xlane.f32.xlu1 %v1592_v0  ;;  %v1809_v28 = vsub.f32 %v1801_v12, %v1808_v27 }
0x103e   : > { %v1810_v29 = vmul.f32 1.442695, %v1809_v28  ;;  %v2406_v28 = vld [vmem:[%s3513_s10 + $0x1] ss:$0 sm:$0xff] }
0x1040   : > { %2833 = vpow2.f32 %v1810_v29 }
0x1042   : > { %v2832_v26 = vpop.eup %2831 }
0x1043   : > { %v1702_v40 = vsel %vm593_vm2, %v2832_v26, 0.0 }
0x1044   : > { %1703 = vadd.xlane.f32.xlu0 %v1702_v40 }
0x104a   : > { %v2834_v30 = vpop.eup %2833 }
0x104b   : > { %v1812_v21 = vsel %vm593_vm2, %v2834_v30, 0.0 }
0x104d   : > { %1708 = vrot.lane.b32.xlu1 %v3278_v25, %s3552_s26  ;;  %s483_s26 = sand.u32 1, %s2901_s19  }
0x104e   : > { %s2266_s30 = scalar_lea.sflag [#allocation3], %s483_s26 }
0x105a   : > { %1598 = vrot.lane.b32.xlu0 %v3278_v25, %s3553_s16  ;;  %s3557_s16 = smov 24  }
0x1071   : > { %1813 = vadd.xlane.f32.xlu1 %v1812_v21 }
0x1082   : > { %1818 = vrot.lane.b32.xlu1 %v3278_v25, %s3554_s23 }
0x10c9   : > { %v1594_v31 = vpop.xlane.xlu1 %1593 }
0x10ca   : > { %2835 = vrcp.f32 %v1594_v31 }
0x10cd   : > { %v1709_v37 = vpop.permute.xlu1 %1708 }
0x10ce   : > { %v1714_v39 = vsel %vm657_vm4, %v1709_v37, 0  ;;  %v2796_v37 = vld [vmem:[%s3509_s6 + $0x68] sm:$0xff]  }
0x10d1   : > { %v1704_v32 = vpop.xlane.xlu0 %1703 }
0x10d2   : > { %2837 = vrcp.f32 %v1704_v32 }
0x10d4   : > { %v2836_v33 = vpop.eup %2835 }
0x10d5   : > { %v1596_v34 = vmul.f32 %v2836_v33, %v2830_v24  ;;  %v1599_v35 = vpop.permute.xlu0 %1598  ;;  %v2791_v24 = vld [vmem:[%s3509_s6 + $0x40] sm:$0xff]   ;;  %v2792_v33 = vld [vmem:[%s3509_s6 + $0x48] sm:$0xff]  }
0x10d6   : > { %v1604_v36 = vsel %vm657_vm4, %v1599_v35, 0  ;;  %v2794_v35 = vld [vmem:[%s3509_s6 + $0x58] sm:$0xff]  }
0x10d7   : > { %2642 = vmatpush3.bf16.msra.mxu1 %v1604_v36  ;;  %v1597_v38 = vpack.c.bf16 %v1596_v34, %v1596_v34  ;;  %v2793_v34 = vld [vmem:[%s3509_s6 + $0x50] sm:$0xff]   ;;  %v2795_v36 = vld [vmem:[%s3509_s6 + $0x60] sm:$0xff]  }
0x10d8   : > { %2653 = vmatprep.subr.bf16.mxu1 %v2911_v8 }
0x10da   : > { %2644 = vmatmul.mubr.msk.bf16.vlgmr.msra.gmra.mrb[28].mxu1 %vm593_vm2, %v1597_v38  ;;  %v2797_v38 = vld [vmem:[%s3509_s6 + $0x70] sm:$0xff]  }
0x10db   : > { %2654 = vmatpush3.bf16.msra.mxu1 %v1714_v39  ;;  %2655 = vmatprep.mubr.msk.bf16.mxu1 %vm2912_vm1, %v2911_v8  ;;  %v2798_v39 = vld [vmem:[%s3509_s6 + $0x78] sm:$0xff]  }
0x10dc   : > { %v2838_v25 = vpop.eup %2837  ;;  %2665 = vmatprep.subr.bf16.mxu1 %v2911_v8 }
0x10dd   : > { %v1706_v41 = vmul.f32 %v2838_v25, %v2832_v26  ;;  %v2413_v25 = vld [vmem:[%s3508_s5 + $0x1] ss:$0 sm:$0xff] }
0x10df   : > { %v1707_v42 = vpack.c.bf16 %v1706_v41, %v1706_v41 }
0x10e2   : > { %2656 = vmatmul.mubr.msk.bf16.vlgmr.msra.gmra.mrb[32].mxu1 %vm593_vm2, %v1707_v42 }
0x10e3   : > { %2667 = vmatprep.mubr.msk.bf16.mxu1 %vm2912_vm1, %v2911_v8 }
0x10fe   : > { %v1814_v43 = vpop.xlane.xlu1 %1813 }
0x10ff   : > { %2839 = vrcp.f32 %v1814_v43 }
0x1102   : > { %v1819_v44 = vpop.permute.xlu1 %1818 }
0x1103   : > { %v1824_v45 = vsel %vm657_vm4, %v1819_v44, 0 }
0x1104   : > { %2666 = vmatpush3.bf16.msra.mxu1 %v1824_v45 }
0x1105   : > { %2679 = vmatprep.subr.bf16.mxu1 %v2911_v8 }
0x1109   : > { %v2840_v46 = vpop.eup %2839 }
0x110a   : > { %v1816_v47 = vmul.f32 %v2840_v46, %v2834_v30  ;;  %v2407_v30 = vld [vmem:[%s3514_s11 + $0x1] ss:$0 sm:$0xff] }
0x110c   : > { %v1817_v48 = vpack.c.bf16 %v1816_v47, %v1816_v47 }
0x110e   : > { %2668 = vmatmul.mubr.msk.bf16.vlgmr.msra.gmra.mrb[36].mxu1 %vm593_vm2, %v1817_v48 }
0x110f   : > { %2683 = vmatprep.mubr.msk.bf16.mxu1 %vm2912_vm1, %v2911_v8  ;;  %2680 = vmatpush3.bf16.msra.mxu1 %v2789_v23 }
0x1110   : > { %2681 = vmatprep.subr.bf16.mxu1 %v2911_v8 }
0x11ad   : > { %v1640_v50 = vpop.f32.mrb[28].mxu1 }
0x11ae   : > { %1867 = vrot.lane.b32.xlu0 %v1640_v50, %s3555_s25  ;;  %v2645_v51 = vpop.f32.mrb[29].mxu1 }
0x11af   : > { %v1643_v52 = vpop.f32.mrb[30].mxu1 }
0x11b0   : > { %v2646_v53 = vpop.f32.mrb[31].mxu1 }
0x11b5   : > { %v1750_v54 = vpop.f32.mrb[32].mxu1 }
0x11b6   : > { %1871 = vrot.lane.b32.xlu1 %v1750_v54, %s3556_s17  ;;  %v2657_v55 = vpop.f32.mrb[33].mxu1  ;;  %s3463_s17 = scalar_lea.hbm %s3518_s15, %s2449_s1 }
0x11b7   : > { %v1753_v57 = vpop.f32.mrb[34].mxu1 }
0x11b8   : > { %v2658_v58 = vpop.f32.mrb[35].mxu1  ;;  %v2434_v57 = vld [vmem:[%s3510_s7 + $0x1] ss:$0 sm:$0xff] }
0x11e1   : > { %v1860_v60 = vpop.f32.mrb[36].mxu1 }
0x11e2   : > { %1875 = vrot.lane.b32.xlu0 %v1860_v60, %s3557_s16  ;;  %v2669_v61 = vpop.f32.mrb[37].mxu1  ;;  %s2342_s16 = sshll.u32 %s483_s26, 3 }
0x11e3   : > { %v1863_v62 = vpop.f32.mrb[38].mxu1  ;;  %s485_s23 = scalar_lea.vmem [#allocation2], %s2342_s16  ;;  %s2851_s16 = sshll.u32 %s2928_s22, 4  ;;  %s2852_s16 = int_to_ptr.vmem [resolvable:$false] %s2851_s16 }
0x11e4   : > { %v2670_v63 = vpop.f32.mrb[39].mxu1  ;;  %s2279_s0 = sshll.u32 %s485_s23, 4  ;;  %s2853_s3 = scalar_lea.vmem %s2852_s16, 256  ;;  %s3458_s0 = int_to_ptr.vmem [resolvable:$true] %s2279_s0 }
0x11e5   : > { %s2847_s2 = scalar_lea.vmem %s3458_s0, 128  ;;  %p2854_p0 = scmp.lt.s32.totalorder %s3458_s0, %s2852_s16 }
0x11e6   : > { %p2848_p11 = scmp.ne.s32.totalorder %s3458_s0, %s2847_s2  ;;  %p2855_p1 = scmp.lt.s32.totalorder %s2853_s3, %s2847_s2 }
0x11e8   : > { %p2849_p12 = pnand %p2848_p11, %p3047_p5  ;;  %p2856_p2 = por %p2855_p1, %p2854_p0 }
0x11ea   : > { %p2850_p13 = pneg %p2849_p12 }
0x11ec   : > { %p2857_p3 = pnand %p2856_p2, %p2850_p13 }
0x1220   : > { %v1868_v1 = vpop.permute.xlu0 %1867 }
0x1221   : > { %v1878_v4 = vsel %vm593_vm2, %v3325_v56, %v1868_v1 }
0x1228   : > { %v1872_v3 = vpop.permute.xlu1 %1871 }
0x1229   : > { %v1879_v5 = vsel %vm1044_vm5, %v1878_v4, %v1872_v3 }
0x1254   : > { %v1876_v6 = vpop.permute.xlu0 %1875 }
0x1255   : > { %v1880_v7 = vsel %vm1046_vm6, %v1879_v5, %v1876_v6 }
0x1256   : > { %v1881_v9 = vpack.c.bf16 %v1880_v7, %v1880_v7 }
0x1258   : > { %2676 = vmatmul.mubr.msk.bf16.vlgmr.msra.gmra.mrb[44].mxu0 %vm500_vm0, %v1881_v9  ;;  %v2799_v9 = vld [vmem:[%s3517_s14] sm:$0xff]  }
0x1259   : > { %2703 = vmatprep.mubr.msk.bf16.mxu0 %vm2912_vm1, %v2911_v8  ;;  %2688 = vmatpush3.bf16.msra.mxu0 %v2791_v24 }
0x125a   : > { %2689 = vmatprep.subr.bf16.mxu0 %v2911_v8 }
0x125d   : > { %2690 = vmatpush3.bf16.msra.mxu0 %v2792_v33 }
0x125e   : > { %2691 = vmatprep.subr.bf16.mxu0 %v2911_v8 }
0x1261   : > { %2692 = vmatpush3.bf16.msra.mxu0 %v2793_v34 }
0x1262   : > { %2693 = vmatprep.subr.bf16.mxu0 %v2911_v8 }
0x1265   : > { %2694 = vmatpush3.bf16.msra.mxu0 %v2794_v35 }
0x1266   : > { %2695 = vmatprep.subr.bf16.mxu0 %v2911_v8 }
0x1269   : > { %2696 = vmatpush3.bf16.msra.mxu0 %v2795_v36 }
0x126a   : > { %2697 = vmatprep.subr.bf16.mxu0 %v2911_v8 }
0x126d   : > { %2698 = vmatpush3.bf16.msra.mxu0 %v2796_v37 }
0x126e   : > { %2699 = vmatprep.subr.bf16.mxu0 %v2911_v8 }
0x1271   : > { %2700 = vmatpush3.bf16.msra.mxu0 %v2797_v38 }
0x1272   : > { %2701 = vmatprep.subr.bf16.mxu0 %v2911_v8 }
0x1275   : > { %2702 = vmatpush3.bf16.msra.mxu0 %v2798_v39 }
0x132b   : > { %v1944_v11 = vpop.f32.mrb[44].mxu0 }
0x132c   : > { %v1945_v12 = vadd.f32 %v2400_v10, %v1944_v11  ;;  %v2677_v13 = vpop.f32.mrb[45].mxu0  ;;  %v2800_v10 = vld [vmem:[%s3517_s14 + $0x8] sm:$0xff]  }
0x132d   : > { %v1947_v14 = vpop.f32.mrb[46].mxu0 }
0x132e   : > { %v3379_v56 = vadd.f32 %v1945_v12, %v3255_v2  ;;  %v2678_v15 = vpop.f32.mrb[47].mxu0  ;;  %v2790_v2 = vld [vmem:[%s3507_s4 + $0x18] sm:$0xff]  }
0x132f   : > { %2682 = vmatpush3.bf16.msra.mxu1 %v2790_v2 }
0x1330   : > { %v1955_v16 = vsel %vm500_vm0, %v3379_v56, 0.0  ;;  %2707 = vmatprep.subr.bf16.mxu1 %v2911_v8 }
0x1331   : > { %1956 = vadd.xlane.f32.xlu1 %v1955_v16  ;;  %v2444_v16 = vld [vmem:[%s3516_s13] ss:$0 sm:$0xff] }
0x13be   : > { %v1957_v17 = vpop.xlane.xlu1 %1956 }
0x13bf   : > { %v1958_v18 = vmul.f32 0.03125, %v1957_v17 }
0x13c1   : > { %v1959_v19 = vsub.f32 %v3379_v56, %v1958_v18 }
0x13c3   : > { %v1960_v20 = vmul.f32 %v1959_v19, %v1959_v19 }
0x13c5   : > { %v1961_v22 = vsel %vm500_vm0, %v1960_v20, 0.0 }
0x13c6   : > { %1962 = vadd.xlane.f32.xlu0 %v1961_v22 }
0x1453   : > { %v1963_v0 = vpop.xlane.xlu0 %1962 }
0x1454   : > { %v1964_v26 = vmul.f32 0.03125, %v1963_v0 }
0x1456   : > { %v1965_v40 = vadd.f32 1e-05, %v1964_v26 }
0x1458   : > { %2841 = vrsqrt.f32 %v1965_v40 }
0x1462   : > { %v2842_v27 = vpop.eup %2841 }
0x1463   : > { %v1967_v29 = vmul.f32 %v2842_v27, %v1959_v19 }
0x1465   : > { %v1974_v21 = vmul.f32 %v2406_v28, %v1967_v29 }
0x1467   : > { %v1981_v31 = vadd.f32 %v2407_v30, %v1974_v21 }
0x1469   : > { %v1982_v32 = vpack.c.bf16 %v1981_v31, %v1981_v31 }
0x146b   : > { %2684 = vmatmul.mubr.msk.bf16.vlgmr.msra.gmra.mrb[40].mxu1 %vm500_vm0, %v1982_v32 }
0x146c   : > { %2711 = vmatprep.mubr.msk.bf16.mxu1 %vm2912_vm1, %v2911_v8  ;;  %2708 = vmatpush3.bf16.msra.mxu1 %v2799_v9 }
0x146d   : > { %2709 = vmatprep.subr.bf16.mxu1 %v2911_v8 }
0x1470   : > { %2710 = vmatpush3.bf16.msra.mxu1 %v2800_v10 }
0x153e   : > { %v2045_v41 = vpop.f32.mrb[40].mxu1 }
0x153f   : > { %v2046_v42 = vadd.f32 %v2413_v25, %v2045_v41  ;;  %v2685_v43 = vpop.f32.mrb[41].mxu1 }
0x1540   : > { %v2048_v44 = vpop.f32.mrb[42].mxu1 }
0x1541   : > { %v2052_v45 = vmul.f32 0.044715, %v2046_v42  ;;  %v2686_v46 = vpop.f32.mrb[43].mxu1  ;;  %v2051_v52 = vmul.f32 0.5, %v2046_v42 }
0x1543   : > { %v2053_v47 = vmul.f32 %v2052_v45, %v2046_v42 }
0x1545   : > { %v2054_v48 = vmul.f32 %v2053_v47, %v2046_v42 }
0x1547   : > { %v2055_v49 = vadd.f32 %v2054_v48, %v2046_v42 }
0x1549   : > { %v2056_v50 = vmul.f32 0.7978846, %v2055_v49 }
0x154b   : > { %2843 = vtanh.f32 %v2056_v50 }
0x1555   : > { %v2844_v51 = vpop.eup %2843 }
0x1556   : > { %v2058_v53 = vadd.f32 1.0, %v2844_v51 }
0x1558   : > { %v2059_v54 = vmul.f32 %v2058_v53, %v2051_v52 }
0x155a   : > { %v2060_v55 = vpack.c.bf16 %v2059_v54, %v2059_v54 }
0x155c   : > { %2704 = vmatmul.mubr.bf16.vlgmr.msra.gmra.mrb[48].mxu0 %v2060_v55 }
0x162f   : > { %v2168_v58 = vpop.f32.mrb[48].mxu0 }
0x1630   : > { %v2169_v59 = vadd.f32 %v2434_v57, %v2168_v58  ;;  %v2705_v60 = vpop.f32.mrb[49].mxu0 }
0x1631   : > { %v2171_v61 = vpop.f32.mrb[50].mxu0 }
0x1632   : > { %v2706_v62 = vpop.f32.mrb[51].mxu0  ;;  %v2174_v63 = vadd.f32 %v2169_v59, %v3379_v56  ;;  %v2443_v56 = vld [vmem:[%s3515_s12] ss:$0 sm:$0xff] }
0x1634   : > { %v2177_v1 = vsel %vm500_vm0, %v2174_v63, 0.0 }
0x1635   : > { %2178 = vadd.xlane.f32.xlu0 %v2177_v1 }
0x16c2   : > { %v2179_v3 = vpop.xlane.xlu0 %2178 }
0x16c3   : > { %v2180_v4 = vmul.f32 0.03125, %v2179_v3 }
0x16c5   : > { %v2181_v5 = vsub.f32 %v2174_v63, %v2180_v4 }
0x16c7   : > { %v2182_v6 = vmul.f32 %v2181_v5, %v2181_v5 }
0x16c9   : > { %v2183_v7 = vsel %vm500_vm0, %v2182_v6, 0.0 }
0x16ca   : > { %2184 = vadd.xlane.f32.xlu1 %v2183_v7 }
0x1757   : > { %v2185_v11 = vpop.xlane.xlu1 %2184 }
0x1758   : > { %v2186_v12 = vmul.f32 0.03125, %v2185_v11 }
0x175a   : > { %v2187_v13 = vadd.f32 1e-05, %v2186_v12 }
0x175c   : > { %2845 = vrsqrt.f32 %v2187_v13 }
0x1766   : > { %v2846_v14 = vpop.eup %2845 }
0x1767   : > { %v2189_v15 = vmul.f32 %v2846_v14, %v2181_v5 }
0x1769   : > { %v2196_v17 = vmul.f32 %v2443_v56, %v2189_v15 }
0x176b   : > { %v2203_v18 = vadd.f32 %v2444_v16, %v2196_v17 }
0x176d   : > { %v2204_v19 = vpack.c.bf16 %v2203_v18, %v2203_v18 }
0x176f   : > { %2712 = vmatmul.mubr.msk.bf16.vlgmr.msra.gmra.mrb[44].mxu1 %vm500_vm0, %v2204_v19 }
0x1842   : > { %v2258_v8 = vpop.f32.mrb[44].mxu1 }
0x1843   : > { %2264 = vst [vmem:[%s485_s23] sm:$0xff] %v2258_v8  ;;  %v2713_v20 = vpop.f32.mrb[45].mxu1 }
0x1844   : > { %v2261_v22 = vpop.f32.mrb[46].mxu1 }
0x1845   : > { %2860 = shalt.err (!%p2857_p3)
}
0x1846   : > { %s2861_s1 = scalar_lea.hbm %s3463_s17, 128  ;;  %s2865_s27 = scalar_lea.hbm %s3518_s15, 256 }
0x1847   : > { %p2862_p4 = scmp.ne.s32.totalorder %s3463_s17, %s2861_s1  ;;  %p2866_p9 = scmp.lt.u32.totalorder %s3463_s17, %s3518_s15 }
0x1848   : > { %p2867_p10 = scmp.lt.u32.totalorder %s2865_s27, %s2861_s1  ;;  %p2869_p12 = scmp.lt.u32.totalorder %s2861_s1, %s3463_s17 }
0x1849   : > { %p2863_p7 = pnand %p2862_p4, %p3047_p5 }
0x184a   : > { %p2868_p11 = por %p2867_p10, %p2866_p9 }
0x184b   : > { %p2864_p8 = pneg %p2863_p7 }
0x184c   : > { %p2870_p13 = por %p2869_p12, %p2868_p11 }
0x184e   : > { %p2871_p0 = pnand %p2870_p13, %p2864_p8 }
0x1850   : > { %2874 = shalt.err (!%p2871_p0)
}
0x1851   : > { %2715 = dma.vmem_to_hbm [thread:$0]  (%p3047_p5), %s3458_s0, 128, %s3463_s17, %s2266_s30   ;;  %v2714_v23 = vpop.f32.mrb[47].mxu1 }
0x1852 PF: > { %p2721_p1 = scmp.ge.s32.totalorder %s2909_s21, 2  ;;  %s2291_s2 = sand.u32 1, %s2897_s18  }
0x1853   : > { %s2292_s3 = scalar_lea.sflag [#allocation3], %s2291_s2 }
0x1854   : > { %p2718_p2 = pnand %p2721_p1, %p3051_p6 }
0x1856   : > { %2892 = dma.done.wait (!%p2718_p2), %s2292_s3, 128  }
0x1857   : > { %2894 = vsyncadd (!%p2718_p2), %s2292_s3, 4294967168  ;;  %s3558_s16 = sld [smem:[#allocation5_spill]]  ;;  %p25_p3 = scmp.ge.s32.totalorder %s3034_s24, 4  }
0x1858   : > { %s3559_s18 = smov %s2901_s19  ;;  %s3560_s19 = smov %s2905_s20 }
0x1859   : > { %s3562_s21 = smov %s3034_s24  ;;  %27 = sbr.rel (!%p25_p3) target bundleno = 8 (0x8), region = 126 }
0x185d   : > { %s3561_s20 = smov %s3558_s16 }
0x1860   :  { %2297 = vsyncpa [#allocation3], 1 }
0x1861   :  { %2299 = vsyncpa [#allocation3 + $0x1], 1 }

</bundles_post_ra>
